<compile_context>
chip_gen: v6e
topology: v6e:2x2x1
jax: 0.10.0
libtpu: 0.0.40
codegen_flags: <defaults>
</compile_context>

<pallas_src>
import functools
import math

import jax
import jax.numpy as jnp
from jax import lax
from jax.experimental import pallas as pl
from jax.experimental.pallas import tpu as pltpu

LANE = 128


def _round_up(x, m):
    return ((x + m - 1) // m) * m


def _pick_tile_p(P):
    """Adaptive pair-chunk size: big enough for the MXU depth, 1 step if possible."""
    base = 128
    cap = 256
    try:
        kind = jax.devices()[0].device_kind.lower()
        if "v5" in kind:          # 128-deep MXU: larger TP only inflates one-hot slabs
            cap = 128
    except Exception:
        pass
    p128 = _round_up(max(P, 1), base)
    if p128 <= cap:
        return p128, p128         # single grid step
    return cap, _round_up(P, cap)


def _vmem_limit_bytes(N, C, K, TP, KC_pad, C_pad, B):
    streamed = 2 * (4 * TP + 4 * TP + 4 * TP * K)                       # tail/head/pair_func (2x buffered)
    resident = 4 * (N * C + 3 * N + K * KC_pad + KC_pad * C_pad
                    + C * C_pad + C_pad) + 2 * C * KC_pad
    out_buf = 2 * 4 * N * C_pad
    scratch = 4 * N * KC_pad + 2 * N * KC_pad                           # scat f32 + xw_rep bf16
    temps = (2 * TP * N + 2 * N * TP + 2 * TP * KC_pad                  # T, H, src (bf16)
             + 4 * 2 * TP * KC_pad                                      # gathered, pfexp (f32)
             + 4 * (2 * N * KC_pad + 3 * B * KC_pad + 2 * B * N))
    est = streamed + resident + out_buf + scratch + temps
    try:
        phys = int(pltpu.get_tpu_info().vmem_capacity_bytes)
    except Exception:
        phys = 64 * 2 ** 20                                             # safe on every generation
    return int(min(int(0.85 * phys), max(2 * est, 16 * 2 ** 20)))


def _hpp_kernel(pf_ref, pw_col_ref, pw_row_ref, tail_ref, head_ref, pfunc_ref,
                ind_ref, e_ref, r_ref, wto_ref, wsc_ref, bias_ref,
                o_ref, scat_ref, xw_rep_ref, *, batch_size, eps):
    f32 = jnp.float32
    bf16 = jnp.bfloat16
    N = pf_ref.shape[0]
    TP = tail_ref.shape[0]
    B = batch_size
    p = pl.program_id(0)

    @pl.when(p == 0)
    def _init():
        scat_ref[...] = jnp.zeros(scat_ref.shape, scat_ref.dtype)
        # grid-invariant relu(x)*w, replicated across the K C-wide blocks and
        # zero-padded to KC_pad lanes, built ONCE via the 0/1 replication matrix R.
        xw = jnp.maximum(pf_ref[...], 0.0) * pw_col_ref[...]            # (N, C) f32
        xw_rep_ref[...] = jnp.dot(xw.astype(bf16), r_ref[...],
                                  preferred_element_type=f32).astype(bf16)

    # --- gather rows at pair_tail for this chunk, at full KC_pad lane width ---
    tail = tail_ref[...]                                                # (TP, 1) int32
    T = (tail == lax.broadcasted_iota(jnp.int32, (TP, N), 1)).astype(bf16)
    gathered = jnp.dot(T, xw_rep_ref[...],
                       preferred_element_type=f32)                      # (TP, KC_pad)

    # --- expand pair_func chunk (TP, K) -> (TP, KC_pad) via the 0/1 matrix E ---
    pfexp = jnp.dot(pfunc_ref[...], e_ref[...],
                    preferred_element_type=f32)                         # (TP, KC_pad)
    src = (gathered * pfexp).astype(bf16)                               # (TP, KC_pad)

    # --- scatter_add over pair_head, fused over all K terms: ONE wide matmul --
    head = head_ref[...]                                                # (1, TP) int32
    H = (lax.broadcasted_iota(jnp.int32, (N, TP), 0) == head).astype(bf16)
    scat_ref[...] += jnp.dot(H, src, preferred_element_type=f32)        # (N, KC_pad)

    # --- finalize on the last pair chunk: weighted BN + fused linears ---------
    @pl.when(p == pl.num_programs(0) - 1)
    def _finalize():
        scat = scat_ref[...]                                            # (N, KC_pad)
        ind = ind_ref[...]                                              # (1, N) int32
        J = (ind == lax.broadcasted_iota(jnp.int32, (B, N), 0)).astype(f32)
        Jw = J * pw_row_ref[...]                                        # (B, N)
        jet = jnp.dot(Jw, scat, preferred_element_type=f32)             # (B, KC_pad)

        # training-mode stats over jets (unbiased var, as in WeightedBatchNorm1d)
        mean = jnp.sum(jet, axis=0, keepdims=True) * (1.0 / B)
        diff = jet - mean
        var = jnp.sum(diff * diff, axis=0, keepdims=True) * (1.0 / (B - 1))
        inv_std = lax.rsqrt(var + eps)                                  # EUP slot
        norm = (scat - mean) * inv_std                                  # (N, KC_pad)

        # fused term-contraction + output linear, plus the shortcut linear,
        # accumulated into one f32 slab with a single combined bias.
        o_ref[...] = (jnp.dot(norm, wto_ref[...], preferred_element_type=f32)
                      + jnp.dot(pf_ref[...], wsc_ref[...], preferred_element_type=f32)
                      + bias_ref[...])                                  # unmasked vst


def higher_point_part_minimal(part_features, part_weight, pair_head, pair_tail,
                              pair_func, part_indicator, params, *,
                              batch_size, eps=1e-5):
    N, C = part_features.shape
    P, K = pair_func.shape
    C_out = params["w_out"].shape[1]
    if batch_size < 2:
        raise ValueError("training-mode WeightedBatchNorm1d needs batch_size >= 2")

    f32 = jnp.float32
    bf16 = jnp.bfloat16
    KC = K * C
    KC_pad = _round_up(KC, LANE)
    C_pad = _round_up(C_out, LANE)
    tile_p, P_pad = _pick_tile_p(P)
    pad = P_pad - P

    pf = part_features.astype(f32)
    pw_col = part_weight.astype(f32).reshape(N, 1)
    pw_row = part_weight.astype(f32).reshape(1, N)
    ind_row = part_indicator.astype(jnp.int32).reshape(1, N)

    # Padded pairs get pair_func == 0 so they contribute nothing to the scatter.
    head_row = jnp.pad(pair_head.astype(jnp.int32).reshape(-1), (0, pad)).reshape(1, P_pad)
    tail_col = jnp.pad(pair_tail.astype(jnp.int32).reshape(-1), (0, pad)).reshape(P_pad, 1)
    pfunc_p = jnp.pad(pair_func.astype(f32), ((0, pad), (0, 0)))        # (P_pad, K)

    cols = jnp.arange(KC)
    # E: (K, KC_pad), E[k, k*C + c] = 1 — expands pair_func to the K C-wide blocks.
    E = jnp.zeros((K, KC_pad), f32).at[cols // C, cols].set(1.0)
    # R: (C, KC_pad), R[c, k*C + c] = 1 — replicates xw across the K blocks (bf16 exact).
    R = jnp.zeros((C, KC_pad), f32).at[cols % C, cols].set(1.0).astype(bf16)

    # Fold term contraction + output linear: W_term_out[k*C+c, o] = tw[k,c] * w_out[c,o].
    tw = params["term_weight"].astype(f32)                              # (K, C)
    w_out = params["w_out"].astype(f32)                                 # (C, C_out)
    wto_block = (tw[:, :, None] * w_out[None, :, :]).reshape(KC, C_out)
    W_term_out = jnp.zeros((KC_pad, C_pad), f32).at[:KC, :C_out].set(wto_block)

    w_sc_p = jnp.zeros((C, C_pad), f32).at[:, :C_out].set(params["w_sc"].astype(f32))
    bias_comb = (params["term_bias"].astype(f32) @ w_out
                 + params["b_out"].astype(f32) + params["b_sc"].astype(f32))
    bias_p = jnp.zeros((1, C_pad), f32).at[0, :C_out].set(bias_comb)

    kernel = functools.partial(_hpp_kernel, batch_size=int(batch_size), eps=float(eps))

    def _full_spec(shape):
        nd = len(shape)
        return pl.BlockSpec(shape, lambda p_, _nd=nd: (0,) * _nd)

    in_specs = [
        _full_spec((N, C)),                                   # part_features
        _full_spec((N, 1)),                                   # part_weight (column)
        _full_spec((1, N)),                                   # part_weight (row)
        pl.BlockSpec((tile_p, 1), lambda p_: (p_, 0)),        # pair_tail chunk
        pl.BlockSpec((1, tile_p), lambda p_: (0, p_)),        # pair_head chunk
        pl.BlockSpec((tile_p, K), lambda p_: (p_, 0)),        # pair_func chunk (K = full dim)
        _full_spec((1, N)),                                   # part_indicator
        _full_spec((K, KC_pad)),                              # E
        _full_spec((C, KC_pad)),                              # R
        _full_spec((KC_pad, C_pad)),                          # fused term+output weight
        _full_spec((C, C_pad)),                               # shortcut weight
        _full_spec((1, C_pad)),                               # combined bias
    ]
    out_spec = pl.BlockSpec((N, C_pad), lambda p_: (0, 0))

    operands = (pf, pw_col, pw_row, tail_col, head_row, pfunc_p, ind_row,
                E, R, W_term_out, w_sc_p, bias_p)

    flops = (2 * P_pad * N * KC_pad          # gather matmul
             + 2 * P_pad * K * KC_pad        # pair_func expansion matmul
             + 2 * P_pad * N * KC_pad        # fused scatter matmul
             + 2 * batch_size * N * KC_pad   # weighted jet matmul
             + 2 * N * KC_pad * C_pad        # fused term + output linear
             + 2 * N * C * C_pad             # shortcut linear
             + 8 * N * KC_pad)               # elementwise BN math
    bytes_accessed = (sum(int(a.size) * a.dtype.itemsize for a in operands)
                      + N * C_pad * 4)

    out = pl.pallas_call(
        kernel,
        out_shape=jax.ShapeDtypeStruct((N, C_pad), f32),
        grid_spec=pltpu.PrefetchScalarGridSpec(
            num_scalar_prefetch=0,
            grid=(P_pad // tile_p,),
            in_specs=in_specs,
            out_specs=out_spec,
            scratch_shapes=[
                pltpu.VMEM((N, KC_pad), f32),    # scat accumulator
                pltpu.VMEM((N, KC_pad), bf16),   # grid-invariant replicated xw
            ],
        ),
        compiler_params=pltpu.CompilerParams(
            dimension_semantics=("arbitrary",),
            vmem_limit_bytes=_vmem_limit_bytes(N, C, K, tile_p, KC_pad, C_pad,
                                               int(batch_size)),
        ),
        cost_estimate=pl.CostEstimate(flops=int(flops),
                                      transcendentals=int(KC_pad),
                                      bytes_accessed=int(bytes_accessed)),
    )(*operands)
    return out[:, :C_out]


def reference(part_features, part_weight, pair_head, pair_tail, pair_func,
              part_indicator, params, *, batch_size, eps=1e-5):
    """Pure-JAX (f32) mirror of the PyTorch forward (training-mode BN stats)."""
    N, C = part_features.shape
    K = pair_func.shape[1]
    pw = part_weight.reshape(N, 1)
    sc = part_features @ params["w_sc"] + params["b_sc"]
    xw = jnp.maximum(part_features, 0.0) * pw
    gathered = xw[pair_tail]                                            # (P, C)
    src = (gathered[:, None, :] * pair_func[:, :, None]).reshape(-1, K * C)
    scat = jnp.zeros((N, K * C), jnp.float32).at[pair_head].add(src)
    jet = jnp.zeros((batch_size, K * C), jnp.float32).at[part_indicator].add(scat * pw)
    mean = jet.mean(axis=0)
    var = jnp.sum((jet - mean) ** 2, axis=0) / (batch_size - 1)
    norm = (scat - mean) / jnp.sqrt(var + eps)
    part = (norm.reshape(N, K, C) * params["term_weight"]).sum(axis=1) + params["term_bias"]
    return part @ params["w_out"] + params["b_out"] + sc


if __name__ == "__main__":
    # Small shapes implied by the forward: N particles, P pairs, B jets.
    # P = 200 exercises pair-chunk padding; adaptive TILE_P collapses it to 1 step.
    N, P, B = 64, 200, 8
    n_terms, in_channels, out_channels = 4, 8, 16

    key = jax.random.PRNGKey(0)
    k0, k1, k2, k3, k4, k5, k6, k7, k8 = jax.random.split(key, 9)

    part_features = jax.random.normal(k0, (N, in_channels), jnp.float32)
    part_weight = jax.random.uniform(k1, (N, 1), jnp.float32, 0.1, 1.0)
    pair_head = jax.random.randint(k2, (P,), 0, N, jnp.int32)
    pair_tail = jax.random.randint(k3, (P,), 0, N, jnp.int32)
    pair_func = jax.random.normal(k4, (P, n_terms), jnp.float32)
    part_indicator = (jnp.arange(N, dtype=jnp.int32) // (N // B))       # jets 0..B-1

    # Deterministic parameter init (shapes from __init__).
    bound_w = math.sqrt(6.0 / in_channels)        # kaiming_uniform, fan_in, relu
    bound_l = 1.0 / math.sqrt(in_channels)        # torch.nn.Linear default
    params = {
        "term_weight": jax.random.uniform(k5, (n_terms, in_channels), jnp.float32,
                                          -bound_w, bound_w),
        "term_bias": jnp.zeros((in_channels,), jnp.float32),
        # Linear weights stored pre-transposed as (in, out) for x @ W.
        "w_sc": jax.random.uniform(k6, (in_channels, out_channels), jnp.float32,
                                   -bound_l, bound_l),
        "b_sc": jax.random.uniform(k7, (out_channels,), jnp.float32, -bound_l, bound_l),
        "w_out": jax.random.uniform(k8, (in_channels, out_channels), jnp.float32,
                                    -bound_l, bound_l),
        "b_out": jnp.zeros((out_channels,), jnp.float32),
    }

    batch_size = int(part_indicator.max()) + 1

    out = higher_point_part_minimal(part_features, part_weight, pair_head,
                                    pair_tail, pair_func, part_indicator,
                                    params, batch_size=batch_size)
    out = jax.block_until_ready(out)

    ref = reference(part_features, part_weight, pair_head, pair_tail, pair_func,
                    part_indicator, params, batch_size=batch_size)
    assert out.shape == (N, out_channels)
    # bf16 MXU operands (one-hots exact, data rounded to ~2^-9 rel) + f32 accumulation:
    # compare against the f32 reference at a bf16-appropriate, output-scaled tolerance.
    err = float(jnp.max(jnp.abs(out - ref)))
    scale = max(1.0, float(jnp.max(jnp.abs(ref))))
    assert err <= 3e-2 * scale, (err, scale)
    print("KERNEL_OK")
</pallas_src>

<mosaic_0001>
module attributes {stable_mosaic.version = 11 : i64} {
  func.func @_hpp_kernel(%arg0: i32, %arg1: memref<64x8xf32, #tpu.memory_space<vmem>>, %arg2: memref<64x1xf32, #tpu.memory_space<vmem>>, %arg3: memref<1x64xf32, #tpu.memory_space<vmem>>, %arg4: memref<256x1xi32, #tpu.memory_space<vmem>>, %arg5: memref<1x256xi32, #tpu.memory_space<vmem>>, %arg6: memref<256x4xf32, #tpu.memory_space<vmem>>, %arg7: memref<1x64xi32, #tpu.memory_space<vmem>>, %arg8: memref<4x128xf32, #tpu.memory_space<vmem>>, %arg9: memref<8x128xbf16, #tpu.memory_space<vmem>>, %arg10: memref<128x128xf32, #tpu.memory_space<vmem>>, %arg11: memref<8x128xf32, #tpu.memory_space<vmem>>, %arg12: memref<1x128xf32, #tpu.memory_space<vmem>>, %arg13: memref<64x128xf32, #tpu.memory_space<vmem>>, %arg14: memref<64x128xf32, #tpu.memory_space<vmem>>, %arg15: memref<64x128xbf16, #tpu.memory_space<vmem>>) attributes {dimension_semantics = [#tpu.dimension_semantics<arbitrary>], iteration_bounds = array<i64: 1>, scalar_prefetch = 0 : i64, scratch_operands = 2 : i64, tpu.core_type = #tpu.core_type<tc>, window_params = [{pipeline_mode = #tpu.pipeline_mode<synchronous>, transform_indices = @transform_0, window_bounds = array<i64: 64, 8>}, {pipeline_mode = #tpu.pipeline_mode<synchronous>, transform_indices = @transform_1, window_bounds = array<i64: 64, 1>}, {pipeline_mode = #tpu.pipeline_mode<synchronous>, transform_indices = @transform_2, window_bounds = array<i64: 1, 64>}, {transform_indices = @transform_3, window_bounds = array<i64: 256, 1>}, {transform_indices = @transform_4, window_bounds = array<i64: 1, 256>}, {transform_indices = @transform_5, window_bounds = array<i64: 256, 4>}, {pipeline_mode = #tpu.pipeline_mode<synchronous>, transform_indices = @transform_6, window_bounds = array<i64: 1, 64>}, {pipeline_mode = #tpu.pipeline_mode<synchronous>, transform_indices = @transform_7, window_bounds = array<i64: 4, 128>}, {pipeline_mode = #tpu.pipeline_mode<synchronous>, transform_indices = @transform_8, window_bounds = array<i64: 8, 128>}, {pipeline_mode = #tpu.pipeline_mode<synchronous>, transform_indices = @transform_9, window_bounds = array<i64: 128, 128>}, {pipeline_mode = #tpu.pipeline_mode<synchronous>, transform_indices = @transform_10, window_bounds = array<i64: 8, 128>}, {pipeline_mode = #tpu.pipeline_mode<synchronous>, transform_indices = @transform_11, window_bounds = array<i64: 1, 128>}, {pipeline_mode = #tpu.pipeline_mode<synchronous>, transform_indices = @transform_12, window_bounds = array<i64: 64, 128>}]} {
    %c0_i32 = arith.constant 0 : i32
    %0 = arith.cmpi eq, %arg0, %c0_i32 : i32
    %1 = arith.extui %0 : i1 to i32
    %c0_i32_0 = arith.constant 0 : i32
    %2 = arith.cmpi ne, %1, %c0_i32_0 : i32
    scf.if %2 {
      %cst_18 = arith.constant 0.000000e+00 : f32
      %31 = vector.broadcast %cst_18 : f32 to vector<64x128xf32>
      %c0_19 = arith.constant 0 : index
      %c0_20 = arith.constant 0 : index
      %32 = vector.load %arg14[%c0_19, %c0_20] : memref<64x128xf32, #tpu.memory_space<vmem>>, vector<64x128xf32>
      tpu.vector_store %arg14[%c0_19, %c0_20], %31 {strides = array<i32>} : memref<64x128xf32, #tpu.memory_space<vmem>>, vector<64x128xf32>,
      %c0_21 = arith.constant 0 : index
      %c0_22 = arith.constant 0 : index
      %33 = vector.load %arg1[%c0_21, %c0_22] : memref<64x8xf32, #tpu.memory_space<vmem>>, vector<64x8xf32>
      %cst_23 = arith.constant 0.000000e+00 : f32
      %34 = vector.broadcast %cst_23 : f32 to vector<64x8xf32>
      %35 = arith.maximumf %33, %34 : vector<64x8xf32>
      %c0_24 = arith.constant 0 : index
      %c0_25 = arith.constant 0 : index
      %36 = vector.load %arg2[%c0_24, %c0_25] : memref<64x1xf32, #tpu.memory_space<vmem>>, vector<64x1xf32>
      %37 = vector.broadcast %36 : vector<64x1xf32> to vector<64x8xf32>
      %38 = arith.mulf %35, %37 : vector<64x8xf32>
      %39 = arith.truncf %38 : vector<64x8xf32> to vector<64x8xbf16>
      %c0_26 = arith.constant 0 : index
      %c0_27 = arith.constant 0 : index
      %40 = vector.load %arg9[%c0_26, %c0_27] : memref<8x128xbf16, #tpu.memory_space<vmem>>, vector<8x128xbf16>
      %cst_28 = arith.constant dense<0.000000e+00> : vector<64x128xf32>
      %41 = tpu.matmul %39, %40, %cst_28 {dimension_numbers = #tpu.dot_dimension_numbers<[1], [0], [0], [1], [0, 0, 1, 1], [], []>} : vector<64x8xbf16>, vector<8x128xbf16>, vector<64x128xf32> -> vector<64x128xf32>
      %42 = arith.truncf %41 : vector<64x128xf32> to vector<64x128xbf16>
      %c0_29 = arith.constant 0 : index
      %c0_30 = arith.constant 0 : index
      %43 = vector.load %arg15[%c0_29, %c0_30] : memref<64x128xbf16, #tpu.memory_space<vmem>>, vector<64x128xbf16>
      tpu.vector_store %arg15[%c0_29, %c0_30], %42 {strides = array<i32>} : memref<64x128xbf16, #tpu.memory_space<vmem>>, vector<64x128xbf16>,
    } else {
    }
    %c0 = arith.constant 0 : index
    %c0_1 = arith.constant 0 : index
    %3 = vector.load %arg4[%c0, %c0_1] : memref<256x1xi32, #tpu.memory_space<vmem>>, vector<256x1xi32>
    %4 = tpu.iota {dimensions = array<i32: 1>} : vector<256x64xi32>
    %5 = vector.broadcast %3 : vector<256x1xi32> to vector<256x64xi32>
    %6 = arith.cmpi eq, %5, %4 : vector<256x64xi32>
    %7 = arith.extui %6 : vector<256x64xi1> to vector<256x64xi32>
    %8 = arith.sitofp %7 : vector<256x64xi32> to vector<256x64xf32>
    %9 = arith.truncf %8 : vector<256x64xf32> to vector<256x64xbf16>
    %c0_2 = arith.constant 0 : index
    %c0_3 = arith.constant 0 : index
    %10 = vector.load %arg15[%c0_2, %c0_3] : memref<64x128xbf16, #tpu.memory_space<vmem>>, vector<64x128xbf16>
    %cst = arith.constant dense<0.000000e+00> : vector<256x128xf32>
    %11 = tpu.matmul %9, %10, %cst {dimension_numbers = #tpu.dot_dimension_numbers<[1], [0], [0], [1], [0, 0, 1, 1], [], []>} : vector<256x64xbf16>, vector<64x128xbf16>, vector<256x128xf32> -> vector<256x128xf32>
    %c0_4 = arith.constant 0 : index
    %c0_5 = arith.constant 0 : index
    %12 = vector.load %arg6[%c0_4, %c0_5] : memref<256x4xf32, #tpu.memory_space<vmem>>, vector<256x4xf32>
    %c0_6 = arith.constant 0 : index
    %c0_7 = arith.constant 0 : index
    %13 = vector.load %arg8[%c0_6, %c0_7] : memref<4x128xf32, #tpu.memory_space<vmem>>, vector<4x128xf32>
    %cst_8 = arith.constant dense<0.000000e+00> : vector<256x128xf32>
    %14 = tpu.matmul %12, %13, %cst_8 {dimension_numbers = #tpu.dot_dimension_numbers<[1], [0], [0], [1], [0, 0, 1, 1], [], []>} : vector<256x4xf32>, vector<4x128xf32>, vector<256x128xf32> -> vector<256x128xf32>
    %15 = arith.mulf %11, %14 : vector<256x128xf32>
    %16 = arith.truncf %15 : vector<256x128xf32> to vector<256x128xbf16>
    %c0_9 = arith.constant 0 : index
    %c0_10 = arith.constant 0 : index
    %17 = vector.load %arg5[%c0_9, %c0_10] : memref<1x256xi32, #tpu.memory_space<vmem>>, vector<1x256xi32>
    %18 = tpu.iota {dimensions = array<i32: 0>} : vector<64x256xi32>
    %19 = vector.broadcast %17 : vector<1x256xi32> to vector<64x256xi32>
    %20 = arith.cmpi eq, %18, %19 : vector<64x256xi32>
    %21 = arith.extui %20 : vector<64x256xi1> to vector<64x256xi32>
    %22 = arith.sitofp %21 : vector<64x256xi32> to vector<64x256xf32>
    %23 = arith.truncf %22 : vector<64x256xf32> to vector<64x256xbf16>
    %c0_11 = arith.constant 0 : index
    %c0_12 = arith.constant 0 : index
    %24 = vector.load %arg14[%c0_11, %c0_12] : memref<64x128xf32, #tpu.memory_space<vmem>>, vector<64x128xf32>
    %cst_13 = arith.constant dense<0.000000e+00> : vector<64x128xf32>
    %25 = tpu.matmul %23, %16, %cst_13 {dimension_numbers = #tpu.dot_dimension_numbers<[1], [0], [0], [1], [0, 0, 1, 1], [], []>} : vector<64x256xbf16>, vector<256x128xbf16>, vector<64x128xf32> -> vector<64x128xf32>
    %26 = arith.addf %24, %25 : vector<64x128xf32>
    %c0_14 = arith.constant 0 : index
    %c0_15 = arith.constant 0 : index
    %27 = vector.load %arg14[%c0_14, %c0_15] : memref<64x128xf32, #tpu.memory_space<vmem>>, vector<64x128xf32>
    tpu.vector_store %arg14[%c0_14, %c0_15], %26 {strides = array<i32>} : memref<64x128xf32, #tpu.memory_space<vmem>>, vector<64x128xf32>,
    %c0_i32_16 = arith.constant 0 : i32
    %28 = arith.cmpi eq, %arg0, %c0_i32_16 : i32
    %29 = arith.extui %28 : i1 to i32
    %c0_i32_17 = arith.constant 0 : i32
    %30 = arith.cmpi ne, %29, %c0_i32_17 : i32
    scf.if %30 {
      %c0_18 = arith.constant 0 : index
      %c0_19 = arith.constant 0 : index
      %31 = vector.load %arg14[%c0_18, %c0_19] : memref<64x128xf32, #tpu.memory_space<vmem>>, vector<64x128xf32>
      %c0_20 = arith.constant 0 : index
      %c0_21 = arith.constant 0 : index
      %32 = vector.load %arg7[%c0_20, %c0_21] : memref<1x64xi32, #tpu.memory_space<vmem>>, vector<1x64xi32>
      %33 = tpu.iota {dimensions = array<i32: 0>} : vector<8x64xi32>
      %34 = vector.broadcast %32 : vector<1x64xi32> to vector<8x64xi32>
      %35 = arith.cmpi eq, %34, %33 : vector<8x64xi32>
      %36 = arith.extui %35 : vector<8x64xi1> to vector<8x64xi32>
      %37 = arith.sitofp %36 : vector<8x64xi32> to vector<8x64xf32>
      %c0_22 = arith.constant 0 : index
      %c0_23 = arith.constant 0 : index
      %38 = vector.load %arg3[%c0_22, %c0_23] : memref<1x64xf32, #tpu.memory_space<vmem>>, vector<1x64xf32>
      %39 = vector.broadcast %38 : vector<1x64xf32> to vector<8x64xf32>
      %40 = arith.mulf %37, %39 : vector<8x64xf32>
      %cst_24 = arith.constant dense<0.000000e+00> : vector<8x128xf32>
      %41 = tpu.matmul %40, %31, %cst_24 {dimension_numbers = #tpu.dot_dimension_numbers<[1], [0], [0], [1], [0, 0, 1, 1], [], []>} : vector<8x64xf32>, vector<64x128xf32>, vector<8x128xf32> -> vector<8x128xf32>
      %cst_25 = arith.constant dense<0.000000e+00> : vector<128xf32>
      %42 = vector.multi_reduction <add>, %41, %cst_25 [0] : vector<8x128xf32> to vector<128xf32>
      %43 = vector.shape_cast %42 : vector<128xf32> to vector<1x128xf32>
      %cst_26 = arith.constant 1.250000e-01 : f32
      %44 = vector.broadcast %cst_26 : f32 to vector<1x128xf32>
      %45 = arith.mulf %43, %44 : vector<1x128xf32>
      %46 = vector.broadcast %45 : vector<1x128xf32> to vector<8x128xf32>
      %47 = arith.subf %41, %46 : vector<8x128xf32>
      %48 = arith.mulf %47, %47 : vector<8x128xf32>
      %cst_27 = arith.constant dense<0.000000e+00> : vector<128xf32>
      %49 = vector.multi_reduction <add>, %48, %cst_27 [0] : vector<8x128xf32> to vector<128xf32>
      %50 = vector.shape_cast %49 : vector<128xf32> to vector<1x128xf32>
      %cst_28 = arith.constant 0.142857149 : f32
      %51 = vector.broadcast %cst_28 : f32 to vector<1x128xf32>
      %52 = arith.mulf %50, %51 : vector<1x128xf32>
      %cst_29 = arith.constant 9.99999974E-6 : f32
      %53 = vector.broadcast %cst_29 : f32 to vector<1x128xf32>
      %54 = arith.addf %52, %53 : vector<1x128xf32>
      %55 = math.rsqrt %54 : vector<1x128xf32>
      %56 = vector.broadcast %45 : vector<1x128xf32> to vector<64x128xf32>
      %57 = arith.subf %31, %56 : vector<64x128xf32>
      %58 = vector.broadcast %55 : vector<1x128xf32> to vector<64x128xf32>
      %59 = arith.mulf %57, %58 : vector<64x128xf32>
      %c0_30 = arith.constant 0 : index
      %c0_31 = arith.constant 0 : index
      %60 = vector.load %arg10[%c0_30, %c0_31] : memref<128x128xf32, #tpu.memory_space<vmem>>, vector<128x128xf32>
      %cst_32 = arith.constant dense<0.000000e+00> : vector<64x128xf32>
      %61 = tpu.matmul %59, %60, %cst_32 {dimension_numbers = #tpu.dot_dimension_numbers<[1], [0], [0], [1], [0, 0, 1, 1], [], []>} : vector<64x128xf32>, vector<128x128xf32>, vector<64x128xf32> -> vector<64x128xf32>
      %c0_33 = arith.constant 0 : index
      %c0_34 = arith.constant 0 : index
      %62 = vector.load %arg1[%c0_33, %c0_34] : memref<64x8xf32, #tpu.memory_space<vmem>>, vector<64x8xf32>
      %c0_35 = arith.constant 0 : index
      %c0_36 = arith.constant 0 : index
      %63 = vector.load %arg11[%c0_35, %c0_36] : memref<8x128xf32, #tpu.memory_space<vmem>>, vector<8x128xf32>
      %cst_37 = arith.constant dense<0.000000e+00> : vector<64x128xf32>
      %64 = tpu.matmul %62, %63, %cst_37 {dimension_numbers = #tpu.dot_dimension_numbers<[1], [0], [0], [1], [0, 0, 1, 1], [], []>} : vector<64x8xf32>, vector<8x128xf32>, vector<64x128xf32> -> vector<64x128xf32>
      %65 = arith.addf %61, %64 : vector<64x128xf32>
      %c0_38 = arith.constant 0 : index
      %c0_39 = arith.constant 0 : index
      %66 = vector.load %arg12[%c0_38, %c0_39] : memref<1x128xf32, #tpu.memory_space<vmem>>, vector<1x128xf32>
      %67 = vector.broadcast %66 : vector<1x128xf32> to vector<64x128xf32>
      %68 = arith.addf %65, %67 : vector<64x128xf32>
      %c0_40 = arith.constant 0 : index
      %c0_41 = arith.constant 0 : index
      %69 = vector.load %arg13[%c0_40, %c0_41] : memref<64x128xf32, #tpu.memory_space<vmem>>, vector<64x128xf32>
      tpu.vector_store %arg13[%c0_40, %c0_41], %68 {strides = array<i32>} : memref<64x128xf32, #tpu.memory_space<vmem>>, vector<64x128xf32>,
    } else {
    }
    return
  }
  func.func @transform_0(%arg0: i32) -> (i32, i32) {
    %c0_i32 = arith.constant 0 : i32
    %c0_i32_0 = arith.constant 0 : i32
    %c0_i32_1 = arith.constant 0 : i32
    return %c0_i32, %c0_i32_0 : i32, i32
  }
  func.func @transform_1(%arg0: i32) -> (i32, i32) {
    %c0_i32 = arith.constant 0 : i32
    %c0_i32_0 = arith.constant 0 : i32
    %c0_i32_1 = arith.constant 0 : i32
    return %c0_i32, %c0_i32_0 : i32, i32
  }
  func.func @transform_2(%arg0: i32) -> (i32, i32) {
    %c0_i32 = arith.constant 0 : i32
    %c0_i32_0 = arith.constant 0 : i32
    %c0_i32_1 = arith.constant 0 : i32
    return %c0_i32, %c0_i32_0 : i32, i32
  }
  func.func @transform_3(%arg0: i32) -> (i32, i32) {
    %c0_i32 = arith.constant 0 : i32
    %c0_i32_0 = arith.constant 0 : i32
    return %arg0, %c0_i32 : i32, i32
  }
  func.func @transform_4(%arg0: i32) -> (i32, i32) {
    %c0_i32 = arith.constant 0 : i32
    %c0_i32_0 = arith.constant 0 : i32
    return %c0_i32, %arg0 : i32, i32
  }
  func.func @transform_5(%arg0: i32) -> (i32, i32) {
    %c0_i32 = arith.constant 0 : i32
    %c0_i32_0 = arith.constant 0 : i32
    return %arg0, %c0_i32 : i32, i32
  }
  func.func @transform_6(%arg0: i32) -> (i32, i32) {
    %c0_i32 = arith.constant 0 : i32
    %c0_i32_0 = arith.constant 0 : i32
    %c0_i32_1 = arith.constant 0 : i32
    return %c0_i32, %c0_i32_0 : i32, i32
  }
  func.func @transform_7(%arg0: i32) -> (i32, i32) {
    %c0_i32 = arith.constant 0 : i32
    %c0_i32_0 = arith.constant 0 : i32
    %c0_i32_1 = arith.constant 0 : i32
    return %c0_i32, %c0_i32_0 : i32, i32
  }
  func.func @transform_8(%arg0: i32) -> (i32, i32) {
    %c0_i32 = arith.constant 0 : i32
    %c0_i32_0 = arith.constant 0 : i32
    %c0_i32_1 = arith.constant 0 : i32
    return %c0_i32, %c0_i32_0 : i32, i32
  }
  func.func @transform_9(%arg0: i32) -> (i32, i32) {
    %c0_i32 = arith.constant 0 : i32
    %c0_i32_0 = arith.constant 0 : i32
    %c0_i32_1 = arith.constant 0 : i32
    return %c0_i32, %c0_i32_0 : i32, i32
  }
  func.func @transform_10(%arg0: i32) -> (i32, i32) {
    %c0_i32 = arith.constant 0 : i32
    %c0_i32_0 = arith.constant 0 : i32
    %c0_i32_1 = arith.constant 0 : i32
    return %c0_i32, %c0_i32_0 : i32, i32
  }
  func.func @transform_11(%arg0: i32) -> (i32, i32) {
    %c0_i32 = arith.constant 0 : i32
    %c0_i32_0 = arith.constant 0 : i32
    %c0_i32_1 = arith.constant 0 : i32
    return %c0_i32, %c0_i32_0 : i32, i32
  }
  func.func @transform_12(%arg0: i32) -> (i32, i32) {
    %c0_i32 = arith.constant 0 : i32
    %c0_i32_0 = arith.constant 0 : i32
    %c0_i32_1 = arith.constant 0 : i32
    return %c0_i32, %c0_i32_0 : i32, i32
  }
}

</mosaic_0001>

<bundles_post_ra>
// kernel: tpu_custom_call.1
= control target key start
LH: loop header
LB: loop body
LE: loop exit
PB: predicated region body
PF: predicated region fallthrough
CT: control target
= control target key end

     0   :  { %v2277_v2 = vmov 0   ;;  %vm145_vm0 = vcmask 1043456   ;;  %s2995_s0 = inlined_call_operand.vmem [shape: f32[64,8], index: 0, kind: input, shape index: {}]   ;;  %s2996_s1 = inlined_call_operand.vmem [shape: f32[64,1], index: 1, kind: input, shape index: {}]   ;;  %s2997_s2 = inlined_call_operand.vmem [shape: f32[1,64], index: 2, kind: input, shape index: {}]   ;;  %s2998_s3 = inlined_call_operand.vmem [shape: s32[256,1], index: 3, kind: input, shape index: {}]   ;;  %s2999_s4 = inlined_call_operand.vmem [shape: s32[1,256], index: 4, kind: input, shape index: {}]   ;;  %s3000_s5 = inlined_call_operand.vmem [shape: f32[256,4], index: 5, kind: input, shape index: {}]   ;;  %s3001_s6 = inlined_call_operand.vmem [shape: s32[1,64], index: 6, kind: input, shape index: {}]   ;;  %s3002_s7 = inlined_call_operand.vmem [shape: f32[4,128], index: 7, kind: input, shape index: {}]   ;;  %s3003_s8 = inlined_call_operand.vmem [shape: bf16[8,128], index: 8, kind: input, shape index: {}]   ;;  %s3004_s9 = inlined_call_operand.vmem [shape: f32[128,128], index: 9, kind: input, shape index: {}]   ;;  %s3005_s10 = inlined_call_operand.vmem [shape: f32[8,128], index: 10, kind: input, shape index: {}]   ;;  %s3006_s11 = inlined_call_operand.vmem [shape: f32[1,128], index: 11, kind: input, shape index: {}]   ;;  %s3007_s12 = inlined_call_operand.hbm [shape: f32[64,128], index: 12, kind: output, shape index: {}]  }
   0x1   :  { %v73_v0 = vld [vmem:[%s2996_s1 + $0x10] sm:$0xff]  ;;  %v71_v1 = vld [vmem:[%s2996_s1] sm:$0xff]  ;;  %2248 = vset.pattern.permute.xlu1 %v2277_v2  ;;  %2247 = vset.pattern.permute.xlu0 %v2277_v2  ;;  %v74_v3 = vld [vmem:[%s2996_s1 + $0x18] sm:$0xff] }
   0x2   :  { %91 = vperm.xlu1 %2248, %v73_v0   ;;  %81 = vperm.xlu0 %2247, %v71_v1   ;;  %v72_v4 = vld [vmem:[%s2996_s1 + $0x8] sm:$0xff]  ;;  %v75_v6 = vld [vmem:[%s2996_s1 + $0x20] sm:$0xff]  ;;  %v78_v7 = vld [vmem:[%s2996_s1 + $0x38] sm:$0xff] }
   0x3   :  { %v76_v5 = vld [vmem:[%s2996_s1 + $0x28] sm:$0xff]  ;;  %v77_v8 = vld [vmem:[%s2996_s1 + $0x30] sm:$0xff]  ;;  %v131_v9 = vld [vmem:[%s3003_s8] sm:$0xf] }
   0x4   :  { %v255_v10 = vld [vmem:[%s2998_s3 + $0x8] sm:$0xff]  ;;  %v254_v11 = vld [vmem:[%s2998_s3] sm:$0xff]  ;;  %2239 = vmatprep.subr.msk.bf16.mxu0 %vm145_vm0, %v131_v9  ;;  %v147_v12 = vsel %vm145_vm0, %v131_v9, 0 }
   0x5   :  { %2055 = vmatpush3.bf16.msra.mxu0 %v147_v12 }
   0x6   :  { %96 = vperm.xlu1 %2248, %v74_v3   ;;  %86 = vperm.xlu0 %2247, %v72_v4  }
   0xa   :  { %106 = vperm.xlu1 %2248, %v76_v5   ;;  %101 = vperm.xlu0 %2247, %v75_v6  }
   0xe   :  { %116 = vperm.xlu1 %2248, %v78_v7   ;;  %111 = vperm.xlu0 %2247, %v77_v8  }
   0xf   :  { %17 = vsyncpa [#allocation5], 0  ;;  %v257_v13 = vld [vmem:[%s2998_s3 + $0x18] sm:$0xff]  ;;  %v256_v14 = vld [vmem:[%s2998_s3 + $0x10] sm:$0xff]  ;;  %vm132_vm1 = vcmask 64512   ;;  %v286_v5 = vlaneseq  ;;  %vm528_vm4 = vcmask 523264  }
  0x10   :  { %v259_v15 = vld [vmem:[%s2998_s3 + $0x28] sm:$0xff]  ;;  %v258_v16 = vld [vmem:[%s2998_s3 + $0x20] sm:$0xff]  ;;  %v261_v17 = vld [vmem:[%s2998_s3 + $0x38] sm:$0xff]  ;;  %vm771_vm13 = vcmask 31744  }
  0x11   :  { %v260_v18 = vld [vmem:[%s2998_s3 + $0x30] sm:$0xff]  ;;  %v263_v19 = vld [vmem:[%s2998_s3 + $0x48] sm:$0xff]  ;;  %v262_v20 = vld [vmem:[%s2998_s3 + $0x40] sm:$0xff] }
  0x12   :  { %292 = vperm.xlu1 %2248, %v255_v10   ;;  %289 = vperm.xlu0 %2247, %v254_v11   ;;  %v265_v21 = vld [vmem:[%s2998_s3 + $0x58] sm:$0xff]  ;;  %v264_v22 = vld [vmem:[%s2998_s3 + $0x50] sm:$0xff]  ;;  %v267_v23 = vld [vmem:[%s2998_s3 + $0x68] sm:$0xff] }
  0x13   :  { %v266_v24 = vld [vmem:[%s2998_s3 + $0x60] sm:$0xff]  ;;  %v269_v25 = vld [vmem:[%s2998_s3 + $0x78] sm:$0xff]  ;;  %v268_v26 = vld [vmem:[%s2998_s3 + $0x70] sm:$0xff] }
  0x14   :  { %v271_v27 = vld [vmem:[%s2998_s3 + $0x88] sm:$0xff]  ;;  %v270_v28 = vld [vmem:[%s2998_s3 + $0x80] sm:$0xff]  ;;  %v273_v29 = vld [vmem:[%s2998_s3 + $0x98] sm:$0xff] }
  0x15   :  { %v272_v30 = vld [vmem:[%s2998_s3 + $0x90] sm:$0xff]  ;;  %v275_v31 = vld [vmem:[%s2998_s3 + $0xa8] sm:$0xff]  ;;  %v274_v32 = vld [vmem:[%s2998_s3 + $0xa0] sm:$0xff] }
  0x16   :  { %298 = vperm.xlu1 %2248, %v257_v13   ;;  %295 = vperm.xlu0 %2247, %v256_v14   ;;  %v277_v33 = vld [vmem:[%s2998_s3 + $0xb8] sm:$0xff]  ;;  %v276_v34 = vld [vmem:[%s2998_s3 + $0xb0] sm:$0xff]  ;;  %v279_v35 = vld [vmem:[%s2998_s3 + $0xc8] sm:$0xff] }
  0x17   :  { %v278_v36 = vld [vmem:[%s2998_s3 + $0xc0] sm:$0xff]  ;;  %v281_v37 = vld [vmem:[%s2998_s3 + $0xd8] sm:$0xff]  ;;  %v280_v38 = vld [vmem:[%s2998_s3 + $0xd0] sm:$0xff] }
  0x18   :  { %v283_v39 = vld [vmem:[%s2998_s3 + $0xe8] sm:$0xff]  ;;  %v282_v40 = vld [vmem:[%s2998_s3 + $0xe0] sm:$0xff]  ;;  %v285_v41 = vld [vmem:[%s2998_s3 + $0xf8] sm:$0xff] }
  0x19   :  { %v284_v42 = vld [vmem:[%s2998_s3 + $0xf0] sm:$0xff]  ;;  %v55_v44 = vld [vmem:[%s2995_s0] sm:$0xff]  ;;  %v58_v45 = vld [vmem:[%s2995_s0 + $0x18] sm:$0xff] }
  0x1a   :  { %304 = vperm.xlu1 %2248, %v259_v15   ;;  %301 = vperm.xlu0 %2247, %v258_v16   ;;  %v57_v43 = vld [vmem:[%s2995_s0 + $0x10] sm:$0xff]  ;;  %v56_v46 = vld [vmem:[%s2995_s0 + $0x8] sm:$0xff]  ;;  %v63_v50 = vmax.f32 %v55_v44, 0.0  ;;  %v66_v51 = vmax.f32 %v58_v45, 0.0  ;;  %v59_v54 = vld [vmem:[%s2995_s0 + $0x20] sm:$0xff]  ;;  %v2502_v15 = vand.u32 127, %v286_v5 }
  0x1b   :  { %v65_v49 = vmax.f32 %v57_v43, 0.0  ;;  %v64_v52 = vmax.f32 %v56_v46, 0.0  ;;  %v60_v53 = vld [vmem:[%s2995_s0 + $0x28] sm:$0xff]  ;;  %v67_v58 = vmax.f32 %v59_v54, 0.0  ;;  %v62_v63 = vld [vmem:[%s2995_s0 + $0x38] sm:$0xff]  ;;  %v61_v0 = vld [vmem:[%s2995_s0 + $0x30] sm:$0xff] }
  0x1c   :  { %v68_v57 = vmax.f32 %v60_v53, 0.0  ;;  %v70_v8 = vmax.f32 %v62_v63, 0.0  ;;  %v69_v9 = vmax.f32 %v61_v0, 0.0  ;;  %v770_v63 = vld [vmem:[%s3002_s7] sm:$0xf] }
  0x1e   :  { %310 = vperm.xlu1 %2248, %v261_v17   ;;  %307 = vperm.xlu0 %2247, %v260_v18  }
  0x22   :  { %316 = vperm.xlu1 %2248, %v263_v19   ;;  %313 = vperm.xlu0 %2247, %v262_v20   ;;  %v3008_v19 = vmov 0.0  }
  0x26   :  { %322 = vperm.xlu1 %2248, %v265_v21   ;;  %319 = vperm.xlu0 %2247, %v264_v22  }
  0x2a   :  { %328 = vperm.xlu1 %2248, %v267_v23   ;;  %325 = vperm.xlu0 %2247, %v266_v24  }
  0x2e   :  { %334 = vperm.xlu1 %2248, %v269_v25   ;;  %331 = vperm.xlu0 %2247, %v268_v26  }
  0x32   :  { %340 = vperm.xlu1 %2248, %v271_v27   ;;  %337 = vperm.xlu0 %2247, %v270_v28  }
  0x36   :  { %346 = vperm.xlu1 %2248, %v273_v29   ;;  %343 = vperm.xlu0 %2247, %v272_v30  }
  0x3a   :  { %352 = vperm.xlu1 %2248, %v275_v31   ;;  %349 = vperm.xlu0 %2247, %v274_v32  }
  0x3e   :  { %358 = vperm.xlu1 %2248, %v277_v33   ;;  %355 = vperm.xlu0 %2247, %v276_v34  }
  0x42   :  { %364 = vperm.xlu1 %2248, %v279_v35   ;;  %361 = vperm.xlu0 %2247, %v278_v36  }
  0x46   :  { %370 = vperm.xlu1 %2248, %v281_v37   ;;  %367 = vperm.xlu0 %2247, %v280_v38  }
  0x4a   :  { %376 = vperm.xlu1 %2248, %v283_v39   ;;  %373 = vperm.xlu0 %2247, %v282_v40  }
  0x4e   :  { %382 = vperm.xlu1 %2248, %v285_v41   ;;  %379 = vperm.xlu0 %2247, %v284_v42  }
  0x7d   :  { %v92_v47 = vpop.permute.xlu1 %91  ;;  %v82_v48 = vpop.permute.xlu0 %81 }
  0x7e   :  { %v121_v59 = vmul.f32 %v92_v47, %v65_v49  ;;  %v119_v60 = vmul.f32 %v82_v48, %v63_v50 }
  0x81   :  { %v97_v55 = vpop.permute.xlu1 %96  ;;  %v87_v56 = vpop.permute.xlu0 %86 }
  0x82   :  { %v122_v61 = vmul.f32 %v97_v55, %v66_v51  ;;  %v120_v62 = vmul.f32 %v87_v56, %v64_v52 }
  0x84   :  { %v128_v1 = vpack.c.bf16 %v122_v61, %v121_v59  ;;  %v127_v2 = vpack.c.bf16 %v120_v62, %v119_v60 }
  0x85   :  { %v107_v3 = vpop.permute.xlu1 %106  ;;  %v102_v4 = vpop.permute.xlu0 %101 }
  0x86   :  { %v124_v6 = vmul.f32 %v107_v3, %v68_v57  ;;  %v123_v7 = vmul.f32 %v102_v4, %v67_v58  ;;  %2056 = vmatprep.mubr.msk.bf16.mxu0 %vm132_vm1, %v127_v2  ;;  %v738_v4 = vld [vmem:[%s3000_s5] sm:$0xff] }
  0x87   :  { %2057 = vmatmul.mubr.msk.bf16.vlgmr.msra.gmra.mxu0 %vm132_vm1, %v128_v1 }
  0x88   :  { %v129_v10 = vpack.c.bf16 %v124_v6, %v123_v7 }
  0x89   :  { %v117_v11 = vpop.permute.xlu1 %116  ;;  %v112_v12 = vpop.permute.xlu0 %111 }
  0x8a   :  { %v126_v13 = vmul.f32 %v117_v11, %v70_v8  ;;  %v125_v14 = vmul.f32 %v112_v12, %v69_v9  ;;  %2060 = vmatprep.mubr.msk.bf16.mxu0 %vm132_vm1, %v129_v10  ;;  %v739_v12 = vld [vmem:[%s3000_s5 + $0x8] sm:$0xff] }
  0x8c   :  { %v130_v16 = vpack.c.bf16 %v126_v13, %v125_v14 }
  0x8d   :  { %v293_v17 = vpop.permute.xlu1 %292  ;;  %v290_v18 = vpop.permute.xlu0 %289 }
  0x8e   :  { %vm385_vm2 = vcmp.eq.s32.totalorder %v293_v17, %v2502_v15  ;;  %vm384_vm3 = vcmp.eq.s32.totalorder %v290_v18, %v2502_v15  ;;  %v740_v17 = vld [vmem:[%s3000_s5 + $0x10] sm:$0xff] }
  0x8f   :  { %v1754_v20 = vsel %vm385_vm2, 1.0, %v3008_v19  ;;  %v1753_v21 = vsel %vm384_vm3, 1.0, %v3008_v19  ;;  %2061 = vmatmul.mubr.msk.bf16.gmra.mxu0 %vm132_vm1, %v130_v16 }
  0x90   :  { %v480_v22 = vpack.c.bf16 %v1754_v20, %v1753_v21  ;;  %v741_v20 = vld [vmem:[%s3000_s5 + $0x18] sm:$0xff]  ;;  %v742_v21 = vld [vmem:[%s3000_s5 + $0x20] sm:$0xff] }
  0x91   :  { %v299_v23 = vpop.permute.xlu1 %298  ;;  %v296_v24 = vpop.permute.xlu0 %295 }
  0x92   :  { %vm387_vm5 = vcmp.eq.s32.totalorder %v299_v23, %v2502_v15  ;;  %vm386_vm6 = vcmp.eq.s32.totalorder %v296_v24, %v2502_v15  ;;  %2072 = vmatprep.mubr.msk.bf16.mxu0 %vm528_vm4, %v480_v22 }
  0x93   :  { %v2513_v25 = vsel %vm387_vm5, 1.0, %v3008_v19  ;;  %v2516_v26 = vsel %vm386_vm6, 1.0, %v3008_v19 }
  0x94   :  { %v481_v27 = vpack.c.bf16 %v2513_v25, %v2516_v26 }
  0x95   :  { %v305_v28 = vpop.permute.xlu1 %304  ;;  %v302_v29 = vpop.permute.xlu0 %301 }
  0x96   :  { %vm389_vm7 = vcmp.eq.s32.totalorder %v305_v28, %v2502_v15  ;;  %vm388_vm8 = vcmp.eq.s32.totalorder %v302_v29, %v2502_v15  ;;  %v743_v28 = vld [vmem:[%s3000_s5 + $0x28] sm:$0xff] }
  0x97   :  { %v1758_v30 = vsel %vm389_vm7, 1.0, %v3008_v19  ;;  %v1757_v31 = vsel %vm388_vm8, 1.0, %v3008_v19 }
  0x98   :  { %v482_v32 = vpack.c.bf16 %v1758_v30, %v1757_v31  ;;  %v744_v30 = vld [vmem:[%s3000_s5 + $0x30] sm:$0xff] }
  0x99   :  { %v311_v35 = vpop.permute.xlu1 %310  ;;  %v308_v36 = vpop.permute.xlu0 %307 }
  0x9a   :  { %2076 = vmatprep.mubr.msk.bf16.mxu1 %vm528_vm4, %v482_v32  ;;  %vm391_vm9 = vcmp.eq.s32.totalorder %v311_v35, %v2502_v15  ;;  %vm390_vm10 = vcmp.eq.s32.totalorder %v308_v36, %v2502_v15  ;;  %v745_v32 = vld [vmem:[%s3000_s5 + $0x38] sm:$0xff]  ;;  %v746_v35 = vld [vmem:[%s3000_s5 + $0x40] sm:$0xff] }
  0x9b   :  { %v1760_v61 = vsel %vm391_vm9, 1.0, %v3008_v19  ;;  %v1759_v62 = vsel %vm390_vm10, 1.0, %v3008_v19 }
  0x9c   :  { %v483_v2 = vpack.c.bf16 %v1760_v61, %v1759_v62 }
  0x9d   :  { %v317_v42 = vpop.permute.xlu1 %316  ;;  %v314_v43 = vpop.permute.xlu0 %313 }
  0x9e   :  { %vm393_vm11 = vcmp.eq.s32.totalorder %v317_v42, %v2502_v15  ;;  %vm392_vm12 = vcmp.eq.s32.totalorder %v314_v43, %v2502_v15  ;;  %v748_v42 = vld [vmem:[%s3000_s5 + $0x50] sm:$0xff] }
  0x9f   :  { %v1762_v0 = vsel %vm393_vm11, 1.0, %v3008_v19  ;;  %v1761_v1 = vsel %vm392_vm12, 1.0, %v3008_v19 }
  0xa0   :  { %v484_v3 = vpack.c.bf16 %v1762_v0, %v1761_v1 }
  0xa1   :  { %v323_v49 = vpop.permute.xlu1 %322  ;;  %v320_v50 = vpop.permute.xlu0 %319 }
  0xa2   :  { %vm395_vm14 = vcmp.eq.s32.totalorder %v323_v49, %v2502_v15  ;;  %vm394_vm15 = vcmp.eq.s32.totalorder %v320_v50, %v2502_v15 }
  0xa3   :  { %v1764_v8 = vsel %vm395_vm14, 1.0, %v3008_v19  ;;  %v1763_v9 = vsel %vm394_vm15, 1.0, %v3008_v19 }
  0xa4   :  { %v485_v13 = vpack.c.bf16 %v1764_v8, %v1763_v9  ;;  %v758_v8 = vld [vmem:[%s3000_s5 + $0xa0] sm:$0xff] }
  0xa5   :  { %v329_v51 = vpop.permute.xlu1 %328  ;;  %v326_v52 = vpop.permute.xlu0 %325 }
  0xa6   :  { %vm397_vm2 = vcmp.eq.s32.totalorder %v329_v51, %v2502_v15  ;;  %vm396_vm3 = vcmp.eq.s32.totalorder %v326_v52, %v2502_v15  ;;  %v751_v52 = vld [vmem:[%s3000_s5 + $0x68] sm:$0xff] }
  0xa7   :  { %v1766_v10 = vsel %vm397_vm2, 1.0, %v3008_v19  ;;  %v1765_v11 = vsel %vm396_vm3, 1.0, %v3008_v19 }
  0xa8   :  { %v486_v18 = vpack.c.bf16 %v1766_v10, %v1765_v11  ;;  %v759_v10 = vld [vmem:[%s3000_s5 + $0xa8] sm:$0xff] }
  0xa9   :  { %v2525_v55 = vpop.permute.xlu1 %334  ;;  %v2527_v56 = vpop.permute.xlu0 %331 }
  0xaa   :  { %vm398_vm5 = vcmp.eq.s32.totalorder %v2527_v56, %v2502_v15  ;;  %v752_v56 = vld [vmem:[%s3000_s5 + $0x70] sm:$0xff] }
  0xab   :  { %v1767_v23 = vsel %vm398_vm5, 1.0, %v3008_v19 }
  0xad   :  { %v341_v59 = vpop.permute.xlu1 %340  ;;  %v338_v60 = vpop.permute.xlu0 %337 }
  0xae   :  { %vm401_vm6 = vcmp.eq.s32.totalorder %v341_v59, %v2502_v15  ;;  %vm400_vm7 = vcmp.eq.s32.totalorder %v338_v60, %v2502_v15  ;;  %v754_v59 = vld [vmem:[%s3000_s5 + $0x80] sm:$0xff] }
  0xaf   :  { %v1770_v24 = vsel %vm401_vm6, 1.0, %v3008_v19  ;;  %v1769_v25 = vsel %vm400_vm7, 1.0, %v3008_v19 }
  0xb0   :  { %v488_v31 = vpack.c.bf16 %v1770_v24, %v1769_v25  ;;  %v2735_v24 = vshrl.u32 %v286_v5, 7  ;;  %v3010_v5 = vmov 1.0|1.0  }
  0xb1   :  { %v347_v6 = vpop.permute.xlu1 %346  ;;  %v344_v7 = vpop.permute.xlu0 %343 }
  0xb2   :  { %vm403_vm8 = vcmp.eq.s32.totalorder %v347_v6, %v2502_v15  ;;  %vm402_vm9 = vcmp.eq.s32.totalorder %v344_v7, %v2502_v15  ;;  %v757_v7 = vld [vmem:[%s3000_s5 + $0x98] sm:$0xff]  ;;  %3023 = vst [vmem:[#allocation7_spill] sm:$0xff] %v2735_v24  ;;  %v1161_v25 = vsub.s32 1, %v2735_v24 }
  0xb3   :  { %v1772_v36 = vsel %vm403_vm8, 1.0, %v3008_v19 }
  0xb5   :  { %v353_v14 = vpop.permute.xlu1 %352  ;;  %v350_v16 = vpop.permute.xlu0 %349 }
  0xb6   :  { %vm405_vm10 = vcmp.eq.s32.totalorder %v353_v14, %v2502_v15  ;;  %vm404_vm11 = vcmp.eq.s32.totalorder %v350_v16, %v2502_v15  ;;  %v762_v14 = vld [vmem:[%s3000_s5 + $0xc0] sm:$0xff]  ;;  %v763_v16 = vld [vmem:[%s3000_s5 + $0xc8] sm:$0xff] }
  0xb9   :  { %v359_v26 = vpop.permute.xlu1 %358 }
  0xba   :  { %vm407_vm12 = vcmp.eq.s32.totalorder %v359_v26, %v2502_v15  ;;  %v1145_v26 = vld [vmem:[%s2999_s4] sm:$0x3] }
 0x147   :  { %v2058_v33 = vpop.f32.mrf.mxu0 }
 0x149   :  { %v183_v34 = vpop.f32.mrf.mxu0 }
 0x14b   :  { %v2059_v37 = vpop.f32.mrf.mxu0 }
 0x14c   :  { %v1899_v38 = vpack.c.bf16 %v2059_v37, %v2058_v33  ;;  %v365_v33 = vpop.permute.xlu1 %364  ;;  %v1771_v37 = vsel %vm402_vm9, 1.0, %v3008_v19 }
 0x14d   :  { %v186_v39 = vpop.f32.mrf.mxu0  ;;  %vm409_vm15 = vcmp.eq.s32.totalorder %v365_v33, %v2502_v15 }
 0x14e   :  { %1911 = vst [vmem:[#allocation3 + $0x8] sm:$0xff] %v1899_v38   ;;  %v1894_v40 = vpack.c.bf16 %v186_v39, %v183_v34  ;;  %v1774_v38 = vsel %vm405_vm10, 1.0, %v3008_v19  ;;  %v1773_v39 = vsel %vm404_vm11, 1.0, %v3008_v19  ;;  %v1778_v50 = vsel %vm409_vm15, 1.0, %v3008_v19 }
 0x14f   :  { %v2062_v41 = vpop.f32.mrf.mxu0  ;;  %v490_v43 = vpack.c.bf16 %v1774_v38, %v1773_v39 }
 0x150   :  { %1895 = vst [vmem:[#allocation3] sm:$0xff] %v1894_v40   ;;  %v747_v40 = vld [vmem:[%s3000_s5 + $0x48] sm:$0xff] }
 0x151   :  { %v199_v44 = vpop.f32.mrf.mxu0 }
 0x153   :  { %v2063_v45 = vpop.f32.mrf.mxu0 }
 0x154   :  { %v1909_v46 = vpack.c.bf16 %v2063_v45, %v2062_v41  ;;  %v489_v41 = vpack.c.bf16 %v1772_v36, %v1771_v37 }
 0x155   :  { %v202_v47 = vpop.f32.mrf.mxu0  ;;  %v2251_v57 = vld [vmem:[#allocation3 + $0x8] sm:$0xff]  }
 0x156   :  { %1913 = vst [vmem:[#allocation3 + $0x18] sm:$0xff] %v1909_v46   ;;  %v1904_v48 = vpack.c.bf16 %v202_v47, %v199_v44  ;;  %v371_v44 = vpop.permute.xlu1 %370  ;;  %v749_v46 = vld [vmem:[%s3000_s5 + $0x58] sm:$0xff]  ;;  %v750_v47 = vld [vmem:[%s3000_s5 + $0x60] sm:$0xff] }
 0x157   :  { %v2252_v58 = vld [vmem:[#allocation3] sm:$0xff]   ;;  %vm411_vm3 = vcmp.eq.s32.totalorder %v371_v44, %v2502_v15 }
 0x158   :  { %1912 = vst [vmem:[#allocation3 + $0x10] sm:$0xff] %v1904_v48   ;;  %v1776_v48 = vsel %vm407_vm12, 1.0, %v3008_v19  ;;  %v1780_v60 = vsel %vm411_vm3, 1.0, %v3008_v19 }
 0x15d   :  { %v2249_v53 = vld [vmem:[#allocation3 + $0x18] sm:$0xff]  }
 0x15e   :  { %2064 = vmatprep.subr.bf16.mxu0 %v2249_v53  ;;  %2231 = vmatprep.subr.bf16.mxu1 %v2249_v53 }
 0x15f   :  { %v2250_v54 = vld [vmem:[#allocation3 + $0x10] sm:$0xff]   ;;  %2065 = vmatpush3.bf16.msra.mxu0 %v2249_v53  ;;  %2235 = vmatpush3.bf16.msra.mxu1 %v2249_v53 }
 0x160   :  { %2066 = vmatprep.subr.bf16.mxu0 %v2250_v54  ;;  %2232 = vmatprep.subr.bf16.mxu1 %v2250_v54 }
 0x163   :  { %2067 = vmatpush3.bf16.msra.mxu0 %v2250_v54  ;;  %2236 = vmatpush3.bf16.msra.mxu1 %v2250_v54  ;;  %v377_v54 = vpop.permute.xlu1 %376 }
 0x164   :  { %2068 = vmatprep.subr.bf16.mxu0 %v2251_v57  ;;  %2233 = vmatprep.subr.bf16.mxu1 %v2251_v57  ;;  %vm413_vm5 = vcmp.eq.s32.totalorder %v377_v54, %v2502_v15 }
 0x165   :  { %v1782_v62 = vsel %vm413_vm5, 1.0, %v3008_v19 }
 0x167   :  { %2069 = vmatpush3.bf16.msra.mxu0 %v2251_v57  ;;  %2237 = vmatpush3.bf16.msra.mxu1 %v2251_v57  ;;  %v383_v0 = vpop.permute.xlu1 %382 }
 0x168   :  { %2070 = vmatprep.subr.bf16.mxu0 %v2252_v58  ;;  %2234 = vmatprep.subr.bf16.mxu1 %v2252_v58  ;;  %vm415_vm7 = vcmp.eq.s32.totalorder %v383_v0, %v2502_v15 }
 0x169   :  { %v1784_v9 = vsel %vm415_vm7, 1.0, %v3008_v19 }
 0x16b   :  { %2071 = vmatpush3.bf16.msra.mxu0 %v2252_v58  ;;  %2238 = vmatpush3.bf16.msra.mxu1 %v2252_v58  ;;  %v753_v58 = vld [vmem:[%s3000_s5 + $0x78] sm:$0xff] }
 0x16c   :  { %2104 = vmatprep.subr.msk.mxu0 %vm145_vm0, %v770_v63 }
 0x16e   :  { %2073 = vmatmul.mubr.msk.bf16.vlgmr.msra.gmra.mxu0 %vm528_vm4, %v481_v27  ;;  %2077 = vmatmul.mubr.msk.bf16.vlgmr.msra.gmra.mxu1 %vm528_vm4, %v483_v2  ;;  %v356_v27 = vpop.permute.xlu0 %355  ;;  %v755_v2 = vld [vmem:[%s3000_s5 + $0x88] sm:$0xff] }
 0x16f   :  { %2080 = vmatprep.mubr.msk.bf16.mxu1 %vm528_vm4, %v484_v3  ;;  %2105 = vmatpush3.msk.msra.mxu0 %vm145_vm0, %v770_v63  ;;  %vm399_vm0 = vcmp.eq.s32.totalorder %v2525_v55, %v2502_v15  ;;  %vm406_vm14 = vcmp.eq.s32.totalorder %v356_v27, %v2502_v15  ;;  %v1157_v27 = vsub.s32 0, %v2735_v24 }
 0x170   :  { %2106 = vmatprep.mubr.msk.f32.mxu0 %vm771_vm13, %v738_v4  ;;  %2154 = vmatprep.subr.mxu0 %v3008_v19  ;;  %v1768_v22 = vsel %vm399_vm0, 1.0, %v3008_v19  ;;  %v1775_v49 = vsel %vm406_vm14, 1.0, %v3008_v19  ;;  %v756_v4 = vld [vmem:[%s3000_s5 + $0x90] sm:$0xff] }
 0x171   :  { %v487_v29 = vpack.c.bf16 %v1768_v22, %v1767_v23  ;;  %v491_v53 = vpack.c.bf16 %v1776_v48, %v1775_v49  ;;  %v768_v22 = vld [vmem:[%s3000_s5 + $0xf0] sm:$0xff]  ;;  %v769_v23 = vld [vmem:[%s3000_s5 + $0xf8] sm:$0xff] }
 0x172   :  { %v362_v34 = vpop.permute.xlu0 %361 }
 0x173   :  { %vm408_vm2 = vcmp.eq.s32.totalorder %v362_v34, %v2502_v15 }
 0x174   :  { %v1777_v51 = vsel %vm408_vm2, 1.0, %v3008_v19 }
 0x175   :  { %v492_v57 = vpack.c.bf16 %v1778_v50, %v1777_v51 }
 0x176   :  { %2081 = vmatmul.mubr.msk.bf16.gmra.mxu1 %vm528_vm4, %v485_v13  ;;  %2107 = vmatmul.mubr.msk.f32.vlgmr.msra.gmra.mxu0 %vm771_vm13, %v739_v12  ;;  %v368_v45 = vpop.permute.xlu0 %367  ;;  %v760_v12 = vld [vmem:[%s3000_s5 + $0xb0] sm:$0xff]  ;;  %v761_v13 = vld [vmem:[%s3000_s5 + $0xb8] sm:$0xff] }
 0x177   :  { %2084 = vmatprep.mubr.msk.bf16.mxu1 %vm528_vm4, %v486_v18  ;;  %2109 = vmatprep.mubr.msk.f32.mxu0 %vm771_vm13, %v740_v17  ;;  %vm410_vm0 = vcmp.eq.s32.totalorder %v368_v45, %v2502_v15  ;;  %v764_v17 = vld [vmem:[%s3000_s5 + $0xd0] sm:$0xff]  ;;  %v765_v18 = vld [vmem:[%s3000_s5 + $0xd8] sm:$0xff] }
 0x178   :  { %v1779_v61 = vsel %vm410_vm0, 1.0, %v3008_v19 }
 0x179   :  { %v493_v3 = vpack.c.bf16 %v1780_v60, %v1779_v61 }
 0x17a   :  { %2110 = vmatmul.mubr.msk.f32.gmra.mxu0 %vm771_vm13, %v741_v20  ;;  %v374_v55 = vpop.permute.xlu0 %373  ;;  %v766_v20 = vld [vmem:[%s3000_s5 + $0xe0] sm:$0xff] }
 0x17b   :  { %2112 = vmatprep.mubr.msk.f32.mxu0 %vm771_vm13, %v742_v21  ;;  %vm412_vm6 = vcmp.eq.s32.totalorder %v374_v55, %v2502_v15  ;;  %v767_v21 = vld [vmem:[%s3000_s5 + $0xe8] sm:$0xff] }
 0x17c   :  { %v1781_v63 = vsel %vm412_vm6, 1.0, %v3008_v19 }
 0x17d   :  { %v494_v6 = vpack.c.bf16 %v1782_v62, %v1781_v63 }
 0x17e   :  { %2085 = vmatmul.mubr.msk.bf16.gmra.mxu1 %vm528_vm4, %v487_v29  ;;  %2113 = vmatmul.mubr.msk.f32.gmra.mxu0 %vm771_vm13, %v743_v28  ;;  %v380_v1 = vpop.permute.xlu0 %379  ;;  %v1148_v28 = vadd.s32 8, %v2735_v24  ;;  %v2743_v29 = vrot.slane %v1145_v26, %v1161_v25 }
 0x17f   :  { %2088 = vmatprep.mubr.msk.bf16.mxu1 %vm528_vm4, %v488_v31  ;;  %2115 = vmatprep.mubr.msk.f32.mxu0 %vm771_vm13, %v744_v30  ;;  %vm414_vm8 = vcmp.eq.s32.totalorder %v380_v1, %v2502_v15  ;;  %v2745_v30 = vrot.slane %v1145_v26, %v1157_v27  ;;  %v3026_v31 = vmov 0 }
 0x180   :  { %v1783_v15 = vsel %vm414_vm8, 1.0, %v3008_v19  ;;  %3024 = vst [vmem:[#allocation8_spill] sm:$0xff] %v2743_v29  ;;  %vm1166_vm9 = vcmp.eq.s32.totalorder %v1148_v28, %v2743_v29 }
 0x181   :  { %v495_v11 = vpack.c.bf16 %v1784_v9, %v1783_v15  ;;  %3025 = vst [vmem:[#allocation9_spill] sm:$0xff] %v2745_v30  ;;  %vm1165_vm10 = vcmp.eq.s32.totalorder %v1148_v28, %v2745_v30  ;;  %vm1163_vm12 = vcmp.eq.s32.totalorder %v2735_v24, %v2745_v30 }
 0x182   :  { %2116 = vmatmul.mubr.msk.f32.gmra.mxu0 %vm771_vm13, %v745_v32  ;;  %vm2754_vm14 = vmpackc.low %vm1165_vm10, %vm1163_vm12 }
 0x183   :  { %2118 = vmatprep.mubr.msk.f32.mxu0 %vm771_vm13, %v746_v35  ;;  %v3027_v31 = vsel %vm2754_vm14, 4294967295, %v3026_v31 }
 0x184   :  { %3028 = vst [vmem:[#allocation10_spill] sm:$0xff] %v3027_v31 }
 0x186   :  { %2089 = vmatmul.mubr.msk.bf16.gmra.mxu1 %vm528_vm4, %v489_v41  ;;  %2119 = vmatmul.mubr.msk.f32.gmra.mxu0 %vm771_vm13, %v747_v40 }
 0x187   :  { %2092 = vmatprep.mubr.msk.bf16.mxu1 %vm528_vm4, %v490_v43  ;;  %2121 = vmatprep.mubr.msk.f32.mxu0 %vm771_vm13, %v748_v42 }
 0x18a   :  { %2122 = vmatmul.mubr.msk.f32.gmra.mxu0 %vm771_vm13, %v749_v46 }
 0x18b   :  { %2124 = vmatprep.mubr.msk.f32.mxu0 %vm771_vm13, %v750_v47 }
 0x18e   :  { %2093 = vmatmul.mubr.msk.bf16.gmra.mxu1 %vm528_vm4, %v491_v53  ;;  %2125 = vmatmul.mubr.msk.f32.gmra.mxu0 %vm771_vm13, %v751_v52 }
 0x18f   :  { %2096 = vmatprep.mubr.msk.bf16.mxu1 %vm528_vm4, %v492_v57  ;;  %2127 = vmatprep.mubr.msk.f32.mxu0 %vm771_vm13, %v752_v56 }
 0x192   :  { %2128 = vmatmul.mubr.msk.f32.gmra.mxu0 %vm771_vm13, %v753_v58 }
 0x193   :  { %2130 = vmatprep.mubr.msk.f32.mxu0 %vm771_vm13, %v754_v59 }
 0x196   :  { %2097 = vmatmul.mubr.msk.bf16.gmra.mxu1 %vm528_vm4, %v493_v3  ;;  %2131 = vmatmul.mubr.msk.f32.gmra.mxu0 %vm771_vm13, %v755_v2 }
 0x197   :  { %2100 = vmatprep.mubr.msk.bf16.mxu1 %vm528_vm4, %v494_v6  ;;  %2133 = vmatprep.mubr.msk.f32.mxu0 %vm771_vm13, %v756_v4 }
 0x19a   :  { %2134 = vmatmul.mubr.msk.f32.gmra.mxu0 %vm771_vm13, %v757_v7 }
 0x19b   :  { %2136 = vmatprep.mubr.msk.f32.mxu0 %vm771_vm13, %v758_v8 }
 0x19e   :  { %2101 = vmatmul.mubr.msk.bf16.gmra.mxu1 %vm528_vm4, %v495_v11  ;;  %2137 = vmatmul.mubr.msk.f32.gmra.mxu0 %vm771_vm13, %v759_v10 }
 0x19f   :  { %2139 = vmatprep.mubr.msk.f32.mxu0 %vm771_vm13, %v760_v12 }
 0x1a2   :  { %2140 = vmatmul.mubr.msk.f32.gmra.mxu0 %vm771_vm13, %v761_v13 }
 0x1a3   :  { %2142 = vmatprep.mubr.msk.f32.mxu0 %vm771_vm13, %v762_v14 }
 0x1a6   :  { %2143 = vmatmul.mubr.msk.f32.gmra.mxu0 %vm771_vm13, %v763_v16 }
 0x1a7   :  { %2145 = vmatprep.mubr.msk.f32.mxu0 %vm771_vm13, %v764_v17 }
 0x1aa   :  { %2146 = vmatmul.mubr.msk.f32.gmra.mxu0 %vm771_vm13, %v765_v18 }
 0x1ab   :  { %2148 = vmatprep.mubr.msk.f32.mxu0 %vm771_vm13, %v766_v20 }
 0x1ae   :  { %2149 = vmatmul.mubr.msk.f32.gmra.mxu0 %vm771_vm13, %v767_v21 }
 0x1af   :  { %2151 = vmatprep.mubr.msk.f32.mxu0 %vm771_vm13, %v768_v22 }
 0x1b2   :  { %2152 = vmatmul.mubr.msk.f32.gmra.mxu0 %vm771_vm13, %v769_v23  ;;  %vm1164_vm13 = vcmp.eq.s32.totalorder %v2735_v24, %v2743_v29 }
 0x1b3   :  { %vm1854_vm11 = vmpackc.low %vm1166_vm9, %vm1164_vm13 }
 0x1b4   :  { %1855 = vmatprep.mubr.msk.bf16.mxu1 %vm1854_vm11, %v3010_v5 }
 0x22e   :  { %v2074_v32 = vpop.f32.mrf.mxu0  ;;  %v2078_v33 = vpop.f32.mrf.mxu1 }
 0x230   :  { %v611_v34 = vpop.f32.mrf.mxu0  ;;  %v627_v35 = vpop.f32.mrf.mxu1 }
 0x232   :  { %v2075_v36 = vpop.f32.mrf.mxu0  ;;  %v2079_v37 = vpop.f32.mrf.mxu1 }
 0x234   :  { %v614_v38 = vpop.f32.mrf.mxu0  ;;  %v630_v39 = vpop.f32.mrf.mxu1 }
 0x236   :  { %v2758_v40 = vpop.f32.mrf.mxu1  ;;  %v2108_v41 = vpop.f32.mrf.mxu0 }
 0x237   :  { %v2760_v42 = vmul.f32 %v2108_v41, %v614_v38 }
 0x238   :  { %v2762_v43 = vpop.f32.mrf.mxu1  ;;  %v938_v44 = vpop.f32.mrf.mxu0 }
 0x239   :  { %3029 = vst [vmem:[#allocation11_spill] sm:$0xff] %v2760_v42  ;;  %v2764_v45 = vmul.f32 %v938_v44, %v611_v34 }
 0x23a   :  { %v2766_v46 = vpop.f32.mrf.mxu1  ;;  %v2111_v47 = vpop.f32.mrf.mxu0 }
 0x23b   :  { %3030 = vst [vmem:[#allocation12_spill] sm:$0xff] %v2764_v45  ;;  %v2770_v49 = vmul.f32 %v2111_v47, %v2075_v36 }
 0x23c   :  { %v2772_v50 = vpop.f32.mrf.mxu1  ;;  %v948_v51 = vpop.f32.mrf.mxu0 }
 0x23d   :  { %3031 = vst [vmem:[#allocation13_spill] sm:$0xff] %v2770_v49  ;;  %v2774_v52 = vmul.f32 %v2074_v32, %v948_v51 }
 0x23e   :  { %v2086_v53 = vpop.f32.mrf.mxu1  ;;  %v2114_v54 = vpop.f32.mrf.mxu0 }
 0x23f   :  { %3032 = vst [vmem:[#allocation14_spill] sm:$0xff] %v2774_v52  ;;  %v2778_v56 = vmul.f32 %v2114_v54, %v630_v39 }
 0x240   :  { %v659_v57 = vpop.f32.mrf.mxu1  ;;  %v958_v58 = vpop.f32.mrf.mxu0 }
 0x241   :  { %v2780_v59 = vmul.f32 %v958_v58, %v627_v35 }
 0x242   :  { %v2087_v60 = vpop.f32.mrf.mxu1  ;;  %v2117_v61 = vpop.f32.mrf.mxu0 }
 0x243   :  { %v2784_v63 = vmul.f32 %v2117_v61, %v2079_v37 }
 0x244   :  { %v662_v0 = vpop.f32.mrf.mxu1  ;;  %v968_v1 = vpop.f32.mrf.mxu0 }
 0x245   :  { %v2786_v2 = vmul.f32 %v2078_v33, %v968_v1 }
 0x246   :  { %v2788_v3 = vpop.f32.mrf.mxu1  ;;  %v2790_v4 = vpop.f32.mrf.mxu0 }
 0x248   :  { %v2794_v7 = vpop.f32.mrf.mxu1  ;;  %v978_v8 = vpop.f32.mrf.mxu0 }
 0x24a   :  { %v2796_v9 = vpop.f32.mrf.mxu1  ;;  %v2123_v15 = vpop.f32.mrf.mxu0 }
 0x24c   :  { %v2798_v10 = vpop.f32.mrf.mxu1  ;;  %v988_v11 = vpop.f32.mrf.mxu0 }
 0x24d   :  { %3033 = vst [vmem:[#allocation15_spill] sm:$0xff] %v2798_v10  ;;  %v1107_v10 = vmul.f32 %v2758_v40, %v988_v11 }
 0x24e   :  { %v2094_v12 = vpop.f32.mrf.mxu1  ;;  %v2126_v13 = vpop.f32.mrf.mxu0 }
 0x24f   :  { %v1110_v24 = vmul.f32 %v2126_v13, %v662_v0 }
 0x250   :  { %v2800_v14 = vpop.f32.mrf.mxu1  ;;  %v998_v16 = vpop.f32.mrf.mxu0 }
 0x251   :  { %v1109_v42 = vmul.f32 %v998_v16, %v659_v57 }
 0x252   :  { %v2095_v17 = vpop.f32.mrf.mxu1  ;;  %v2129_v18 = vpop.f32.mrf.mxu0 }
 0x253   :  { %v1112_v6 = vmul.f32 %v2129_v18, %v2087_v60 }
 0x254   :  { %v1008_v20 = vpop.f32.mrf.mxu0  ;;  %v694_v21 = vpop.f32.mrf.mxu1  ;;  %v3037_v0 = vld [vmem:[#allocation15_spill] sm:$0xff] }
 0x255   :  { %v1111_v19 = vmul.f32 %v2086_v53, %v1008_v20  ;;  %v1135_v53 = vpack.c.bf16 %v1110_v24, %v1109_v42 }
 0x256   :  { %v2802_v22 = vpop.f32.mrf.mxu0  ;;  %v2098_v25 = vpop.f32.mrf.mxu1 }
 0x257   :  { %3034 = vst [vmem:[#allocation16_spill] sm:$0xff] %v2802_v22  ;;  %v1136_v29 = vpack.c.bf16 %v1112_v6, %v1111_v19 }
 0x258   :  { %v2804_v23 = vpop.f32.mrf.mxu0  ;;  %v707_v28 = vpop.f32.mrf.mxu1 }
 0x25a   :  { %v2135_v26 = vpop.f32.mrf.mxu0  ;;  %v2099_v34 = vpop.f32.mrf.mxu1 }
 0x25c   :  { %v1028_v27 = vpop.f32.mrf.mxu0  ;;  %v710_v37 = vpop.f32.mrf.mxu1 }
 0x25e   :  { %v2138_v32 = vpop.f32.mrf.mxu0  ;;  %v2102_v41 = vpop.f32.mrf.mxu1 }
 0x260   :  { %v1038_v33 = vpop.f32.mrf.mxu0  ;;  %v723_v51 = vpop.f32.mrf.mxu1 }
 0x261   :  { %v1117_v24 = vmul.f32 %v1038_v33, %v2800_v14  ;;  %v3047_v14 = vmov 1.0|1.0  }
 0x262   :  { %v2141_v35 = vpop.f32.mrf.mxu0  ;;  %v2103_v61 = vpop.f32.mrf.mxu1 }
 0x264   :  { %v1048_v36 = vpop.f32.mrf.mxu0  ;;  %v726_v30 = vpop.f32.mrf.mxu1 }
 0x266   :  { %v2144_v38 = vpop.f32.mrf.mxu0 }
 0x267   :  { %v1122_v60 = vmul.f32 %v2144_v38, %v710_v37 }
 0x268   :  { %v1058_v39 = vpop.f32.mrf.mxu0 }
 0x269   :  { %v1121_v20 = vmul.f32 %v1058_v39, %v707_v28 }
 0x26a   :  { %v2147_v44 = vpop.f32.mrf.mxu0 }
 0x26b   :  { %v1124_v22 = vmul.f32 %v2147_v44, %v2099_v34 }
 0x26c   :  { %v1068_v47 = vpop.f32.mrf.mxu0 }
 0x26d   :  { %v1123_v52 = vmul.f32 %v2098_v25, %v1068_v47 }
 0x26e   :  { %v2150_v54 = vpop.f32.mrf.mxu0 }
 0x26f   :  { %v1126_v31 = vmul.f32 %v2150_v54, %v726_v30  ;;  %v1105_v30 = vmul.f32 %v978_v8, %v2762_v43  ;;  %v3035_v43 = vpack.c.bf16 %v2784_v63, %v2786_v2 }
 0x270   :  { %v1078_v58 = vpop.f32.mrf.mxu0 }
 0x271   :  { %v1125_v48 = vmul.f32 %v1078_v58, %v723_v51  ;;  %v1142_v51 = vpack.c.bf16 %v1124_v22, %v1123_v52  ;;  %v1116_v52 = vmul.f32 %v2135_v26, %v2796_v9  ;;  %v3041_v9 = vld [vmem:[#allocation14_spill] sm:$0xff]  ;;  %v3050_v22 = vmov 0.0  }
 0x272   :  { %v2153_v1 = vpop.f32.mrf.mxu0 }
 0x273   :  { %v1128_v55 = vmul.f32 %v2153_v1, %v2103_v61  ;;  %v1143_v49 = vpack.c.bf16 %v1126_v31, %v1125_v48  ;;  %v1141_v31 = vpack.c.bf16 %v1122_v60, %v1121_v20  ;;  %v1115_v48 = vmul.f32 %v2788_v3, %v1028_v27  ;;  %v3039_v3 = vld [vmem:[#allocation7_spill] sm:$0xff] }
 0x274   :  { %v1088_v5 = vpop.f32.mrf.mxu0  ;;  %v1149_v8 = vadd.s32 16, %v3039_v3  ;;  %v1150_v63 = vadd.s32 24, %v3039_v3  ;;  %v1152_v13 = vadd.s32 40, %v3039_v3  ;;  %v1153_v18 = vadd.s32 48, %v3039_v3  ;;  %v1870_v1 = vld [vmem:[%s3001_s6] ss:$0 sm:$0xff] }
 0x275   :  { %v1127_v62 = vmul.f32 %v2102_v41, %v1088_v5  ;;  %v1108_v5 = vmul.f32 %v2123_v15, %v2766_v46  ;;  %v1118_v46 = vmul.f32 %v2138_v32, %v694_v21  ;;  %v1138_v57 = vpack.c.bf16 %v1116_v52, %v1115_v48  ;;  %v3040_v15 = vld [vmem:[#allocation13_spill] sm:$0xff]  ;;  %v1872_v60 = vld [vmem:[%s2997_s2] ss:$0 sm:$0xff]  ;;  %v1447_v52 = vld [vmem:[%s3004_s9 + $0x28] sm:$0xff] }
 0x276   :  { %v1154_v21 = vadd.s32 56, %v3039_v3  ;;  %v1450_v48 = vld [vmem:[%s3004_s9 + $0x40] sm:$0xff] }
 0x277   :  { %v1144_v45 = vpack.c.bf16 %v1128_v55, %v1127_v62  ;;  %v1134_v19 = vpack.c.bf16 %v1108_v5, %v1107_v10  ;;  %v1119_v55 = vmul.f32 %v2094_v12, %v1048_v36  ;;  %v3036_v62 = vpack.c.bf16 %v2778_v56, %v2780_v59  ;;  %v3044_v56 = vld [vmem:[#allocation11_spill] sm:$0xff]  ;;  %v3045_v59 = vld [vmem:[#allocation12_spill] sm:$0xff] }
 0x278   :  { %v3042_v10 = vpack.c.bf16 %v3040_v15, %v3041_v9  ;;  %v3046_v11 = vpack.c.bf16 %v3044_v56, %v3045_v59  ;;  %v1151_v12 = vadd.s32 32, %v3039_v3  ;;  %v1462_v15 = vld [vmem:[%s2995_s0 + $0x20] sm:$0xff]  ;;  %v1463_v9 = vld [vmem:[%s2995_s0 + $0x28] sm:$0xff] }
 0x279   :  { %1972 = vmatprep.subr.bf16.mxu1 %v1144_v45  ;;  %v1120_v45 = vmul.f32 %v2141_v35, %v2095_v17  ;;  %v3049_v17 = vld [vmem:[#allocation9_spill] sm:$0xff] }
 0x27a   :  { %1973 = vmatpush3.bf16.msra.mxu1 %v1136_v29  ;;  %v1106_v29 = vmul.f32 %v2790_v4, %v2772_v50  ;;  %v1113_v50 = vmul.f32 %v2804_v23, %v2794_v7  ;;  %v3038_v4 = vld [vmem:[#allocation16_spill] sm:$0xff]  ;;  %vm1167_vm0 = vcmp.eq.s32.totalorder %v1149_v8, %v3049_v17  ;;  %vm1169_vm5 = vcmp.eq.s32.totalorder %v1150_v63, %v3049_v17 }
 0x27b   :  { %1974 = vmatprep.subr.bf16.mxu1 %v1143_v49  ;;  %v1140_v42 = vpack.c.bf16 %v1120_v45, %v1119_v55  ;;  %v1139_v49 = vpack.c.bf16 %v1118_v46, %v1117_v24  ;;  %v1114_v6 = vmul.f32 %v3038_v4, %v3037_v0  ;;  %v3043_v7 = vld [vmem:[#allocation8_spill] sm:$0xff]  ;;  %vm1860_vm8 = vmpackc.low %vm1169_vm5, %vm1167_vm0  ;;  %vm1171_vm9 = vcmp.eq.s32.totalorder %v1151_v12, %v3049_v17  ;;  %v1453_v24 = vld [vmem:[%s3004_s9 + $0x58] sm:$0xff] }
 0x27c   :  { %v1133_v40 = vpack.c.bf16 %v1106_v29, %v1105_v30  ;;  %vm1168_vm15 = vcmp.eq.s32.totalorder %v1149_v8, %v3043_v7  ;;  %vm1170_vm2 = vcmp.eq.s32.totalorder %v1150_v63, %v3043_v7  ;;  %vm1172_vm6 = vcmp.eq.s32.totalorder %v1151_v12, %v3043_v7  ;;  %v1456_v29 = vld [vmem:[%s3004_s9 + $0x70] sm:$0xff]  ;;  %v1455_v45 = vld [vmem:[%s3004_s9 + $0x68] sm:$0xff]  ;;  %v1445_v0 = vld [vmem:[%s3004_s9 + $0x18] sm:$0xff] }
 0x27d   :  { %v1137_v2 = vpack.c.bf16 %v1114_v6, %v1113_v50  ;;  %vm1858_vm3 = vmpackc.low %vm1170_vm2, %vm1168_vm15  ;;  %vm1174_vm7 = vcmp.eq.s32.totalorder %v1152_v13, %v3043_v7  ;;  %vm1173_vm10 = vcmp.eq.s32.totalorder %v1152_v13, %v3049_v17  ;;  %vm1176_vm11 = vcmp.eq.s32.totalorder %v1153_v18, %v3043_v7  ;;  %v1451_v46 = vld [vmem:[%s3004_s9 + $0x48] sm:$0xff]  ;;  %v1466_v50 = vld [vmem:[%s3005_s10] sm:$0xff] }
 0x27e   :  { %1975 = vmatpush3.bf16.msra.mxu1 %v1135_v53  ;;  %vm1862_vm13 = vmpackc.low %vm1174_vm7, %vm1172_vm6  ;;  %vm1178_vm12 = vcmp.eq.s32.totalorder %v1154_v21, %v3043_v7  ;;  %vm1175_vm2 = vcmp.eq.s32.totalorder %v1153_v18, %v3049_v17  ;;  %vm2280_vm5 = vmmov 0   ;;  %vm1324_vm6 = vcmp.eq.s32.totalorder %v1870_v1, %v3039_v3  ;;  %v1444_v4 = vld [vmem:[%s3004_s9 + $0x10] sm:$0xff]  ;;  %v1443_v6 = vld [vmem:[%s3004_s9 + $0x8] sm:$0xff] }
 0x27f   :  { %1976 = vmatprep.subr.bf16.mxu1 %v1142_v51  ;;  %vm1866_vm15 = vmpackc.low %vm1178_vm12, %vm1176_vm11  ;;  %2170 = vmatprep.mubr.msk.f32.mxu0 %vm2280_vm5, %v3050_v22  ;;  %v1871_v5 = vsel %vm1324_vm6, 1.0, %v3050_v22  ;;  %v1442_v3 = vld [vmem:[%s3004_s9] sm:$0xff]  ;;  %v1459_v8 = vld [vmem:[%s2995_s0 + $0x8] sm:$0xff] }
 0x280   :  { %v1460_v63 = vld [vmem:[%s2995_s0 + $0x10] sm:$0xff]  ;;  %v1465_v7 = vld [vmem:[%s2995_s0 + $0x38] sm:$0xff] }
 0x282   :  { %1977 = vmatpush3.bf16.msra.mxu1 %v1134_v19  ;;  %v1334_v19 = vmul.f32 %v1872_v60, %v1871_v5 }
 0x283   :  { %1978 = vmatprep.subr.bf16.mxu1 %v1141_v31  ;;  %v1457_v31 = vld [vmem:[%s3004_s9 + $0x78] sm:$0xff] }
 0x286   :  { %1979 = vmatpush3.bf16.msra.mxu1 %v1133_v40  ;;  %v1454_v40 = vld [vmem:[%s3004_s9 + $0x60] sm:$0xff] }
 0x287   :  { %1980 = vmatprep.subr.bf16.mxu1 %v1140_v42  ;;  %v1452_v42 = vld [vmem:[%s3004_s9 + $0x50] sm:$0xff] }
 0x28a   :  { %1981 = vmatpush3.bf16.msra.mxu1 %v3035_v43  ;;  %v1448_v43 = vld [vmem:[%s3004_s9 + $0x30] sm:$0xff] }
 0x28b   :  { %1982 = vmatprep.subr.bf16.mxu1 %v1139_v49  ;;  %v1449_v49 = vld [vmem:[%s3004_s9 + $0x38] sm:$0xff] }
 0x28e   :  { %1983 = vmatpush3.bf16.msra.mxu1 %v3036_v62  ;;  %v1446_v62 = vld [vmem:[%s3004_s9 + $0x20] sm:$0xff] }
 0x28f   :  { %1984 = vmatprep.subr.bf16.mxu1 %v1138_v57  ;;  %v1458_v57 = vld [vmem:[%s2995_s0] sm:$0xff] }
 0x292   :  { %1985 = vmatpush3.bf16.msra.mxu1 %v3042_v10  ;;  %v1464_v10 = vld [vmem:[%s2995_s0 + $0x30] sm:$0xff] }
 0x293   :  { %1986 = vmatprep.subr.bf16.mxu1 %v1137_v2  ;;  %v1461_v2 = vld [vmem:[%s2995_s0 + $0x18] sm:$0xff] }
 0x296   :  { %1987 = vmatpush3.bf16.msra.mxu1 %v3046_v11 }
 0x297   :  { %2187 = vmatprep.subr.mxu1 %v1457_v31 }
 0x299   :  { %1857 = vmatmul.mubr.msk.bf16.vlgmr.msra.gmra.mxu1 %vm2754_vm14, %v3047_v14  ;;  %vm1864_vm14 = vmpackc.low %vm1173_vm10, %vm1171_vm9 }
 0x29a   :  { %1859 = vmatprep.mubr.msk.bf16.mxu1 %vm1858_vm3, %v3047_v14  ;;  %vm1177_vm3 = vcmp.eq.s32.totalorder %v1154_v21, %v3049_v17  ;;  %2188 = vmatpush3.msra.mxu1 %v1457_v31 }
 0x29b   :  { %vm1868_vm0 = vmpackc.low %vm1177_vm3, %vm1175_vm2  ;;  %2189 = vmatprep.subr.mxu1 %v1456_v29 }
 0x29c   :  { %2190 = vmatpush3.msra.mxu1 %v1456_v29 }
 0x29d   :  { %2191 = vmatprep.subr.mxu1 %v1455_v45 }
 0x29e   :  { %2192 = vmatpush3.msra.mxu1 %v1455_v45 }
 0x29f   :  { %2193 = vmatprep.subr.mxu1 %v1454_v40 }
 0x2a0   :  { %2194 = vmatpush3.msra.mxu1 %v1454_v40 }
 0x2a1   :  { %1861 = vmatmul.mubr.msk.bf16.gmra.mxu1 %vm1860_vm8, %v3047_v14  ;;  %2195 = vmatprep.subr.mxu1 %v1453_v24 }
 0x2a2   :  { %1863 = vmatprep.mubr.msk.bf16.mxu1 %vm1862_vm13, %v3047_v14  ;;  %2196 = vmatpush3.msra.mxu1 %v1453_v24 }
 0x2a3   :  { %2197 = vmatprep.subr.mxu1 %v1452_v42 }
 0x2a4   :  { %2198 = vmatpush3.msra.mxu1 %v1452_v42 }
 0x2a5   :  { %2199 = vmatprep.subr.mxu1 %v1451_v46 }
 0x2a6   :  { %2200 = vmatpush3.msra.mxu1 %v1451_v46 }
 0x2a7   :  { %2201 = vmatprep.subr.mxu1 %v1450_v48 }
 0x2a8   :  { %2202 = vmatpush3.msra.mxu1 %v1450_v48 }
 0x2a9   :  { %1865 = vmatmul.mubr.msk.bf16.gmra.mxu1 %vm1864_vm14, %v3047_v14  ;;  %2203 = vmatprep.subr.mxu1 %v1449_v49 }
 0x2aa   :  { %1867 = vmatprep.mubr.msk.bf16.mxu1 %vm1866_vm15, %v3047_v14  ;;  %2204 = vmatpush3.msra.mxu1 %v1449_v49 }
 0x2ab   :  { %2205 = vmatprep.subr.mxu1 %v1448_v43 }
 0x2ac   :  { %2206 = vmatpush3.msra.mxu1 %v1448_v43 }
 0x2ad   :  { %2207 = vmatprep.subr.mxu1 %v1447_v52 }
 0x2ae   :  { %2208 = vmatpush3.msra.mxu1 %v1447_v52 }
 0x2af   :  { %2209 = vmatprep.subr.mxu1 %v1446_v62 }
 0x2b0   :  { %2210 = vmatpush3.msra.mxu1 %v1446_v62 }
 0x2b1   :  { %1869 = vmatmul.mubr.msk.bf16.gmra.mxu1 %vm1868_vm0, %v3047_v14  ;;  %2211 = vmatprep.subr.mxu1 %v1445_v0 }
 0x2b2   :  { %2212 = vmatpush3.msra.mxu1 %v1445_v0 }
 0x2b3   :  { %2213 = vmatprep.subr.mxu1 %v1444_v4 }
 0x2b4   :  { %2214 = vmatpush3.msra.mxu1 %v1444_v4 }
 0x2b5   :  { %2215 = vmatprep.subr.mxu1 %v1443_v6 }
 0x2b6   :  { %2216 = vmatpush3.msra.mxu1 %v1443_v6 }
 0x2b7   :  { %2217 = vmatprep.subr.mxu1 %v1442_v3 }
 0x2b8   :  { %2218 = vmatpush3.msra.mxu1 %v1442_v3 }
 0x359   :  { %v1988_v23 = vpop.f32.mrf.mxu1 }
 0x35b   :  { %v1989_v25 = vpop.f32.mrf.mxu1 }
 0x35c   :  { %v2892_v55 = vadd.f32 %v1989_v25, %v1988_v23 }
 0x35d   :  { %v1991_v26 = vpop.f32.mrf.mxu1 }
 0x35f   :  { %v1992_v27 = vpop.f32.mrf.mxu1 }
 0x360   :  { %v2888_v30 = vadd.f32 %v1992_v27, %v1991_v26 }
 0x361   :  { %v1994_v28 = vpop.f32.mrf.mxu1 }
 0x363   :  { %v1995_v32 = vpop.f32.mrf.mxu1 }
 0x364   :  { %v2880_v51 = vadd.f32 %v1995_v32, %v1994_v28 }
 0x365   :  { %v1997_v33 = vpop.f32.mrf.mxu1 }
 0x367   :  { %v1998_v34 = vpop.f32.mrf.mxu1 }
 0x368   :  { %v2876_v20 = vadd.f32 %v1998_v34, %v1997_v33 }
 0x369   :  { %v2000_v35 = vpop.f32.mrf.mxu1 }
 0x36b   :  { %v2001_v36 = vpop.f32.mrf.mxu1 }
 0x36c   :  { %v2871_v53 = vadd.f32 %v2001_v36, %v2000_v35 }
 0x36d   :  { %v2003_v37 = vpop.f32.mrf.mxu1 }
 0x36f   :  { %v2004_v38 = vpop.f32.mrf.mxu1 }
 0x370   :  { %v2864_v61 = vadd.f32 %v2004_v38, %v2003_v37 }
 0x371   :  { %v2006_v39 = vpop.f32.mrf.mxu1 }
 0x373   :  { %v2007_v41 = vpop.f32.mrf.mxu1 }
 0x374   :  { %v2860_v58 = vadd.f32 %v2007_v41, %v2006_v39 }
 0x375   :  { %v2009_v44 = vpop.f32.mrf.mxu1 }
 0x377   :  { %v2010_v47 = vpop.f32.mrf.mxu1 }
 0x378   :  { %v2858_v54 = vadd.f32 %v2010_v47, %v2009_v44 }
 0x37a   :  { %2155 = vmatpush3.msra.mxu0 %v2858_v54 }
 0x37b   :  { %2156 = vmatprep.subr.mxu0 %v3050_v22 }
 0x37c   :  { %2157 = vmatpush3.msra.mxu0 %v2860_v58 }
 0x37d   :  { %2158 = vmatprep.subr.mxu0 %v3050_v22 }
 0x37e   :  { %2159 = vmatpush3.msra.mxu0 %v2864_v61 }
 0x37f   :  { %2160 = vmatprep.subr.mxu0 %v3050_v22 }
 0x380   :  { %2161 = vmatpush3.msra.mxu0 %v2871_v53 }
 0x381   :  { %2162 = vmatprep.subr.mxu0 %v3050_v22 }
 0x382   :  { %2163 = vmatpush3.msra.mxu0 %v2876_v20 }
 0x383   :  { %2164 = vmatprep.subr.mxu0 %v3050_v22 }
 0x384   :  { %2165 = vmatpush3.msra.mxu0 %v2880_v51 }
 0x385   :  { %2166 = vmatprep.subr.mxu0 %v3050_v22 }
 0x386   :  { %2167 = vmatpush3.msra.mxu0 %v2888_v30 }
 0x387   :  { %2168 = vmatprep.subr.mxu0 %v3050_v22 }
 0x388   :  { %2169 = vmatpush3.msra.mxu0 %v2892_v55 }
 0x389   :  { %2171 = vmatmul.mubr.msk.f32.vlgmr.msra.gmra.mxu0 %vm528_vm4, %v1334_v19  ;;  %2173 = vmatprep.subr.mxu0 %v1466_v50 }
 0x38a   :  { %2174 = vmatpush3.msra.mxu0 %v1466_v50  ;;  %2175 = vmatprep.mubr.msk.f32.mxu0 %vm132_vm1, %v1458_v57 }
 0x38d   :  { %2176 = vmatmul.mubr.msk.f32.vlgmr.msra.gmra.mxu0 %vm132_vm1, %v1459_v8 }
 0x38e   :  { %2178 = vmatprep.mubr.msk.f32.mxu0 %vm132_vm1, %v1460_v63 }
 0x391   :  { %2179 = vmatmul.mubr.msk.f32.gmra.mxu0 %vm132_vm1, %v1461_v2 }
 0x392   :  { %2181 = vmatprep.mubr.msk.f32.mxu0 %vm132_vm1, %v1462_v15 }
 0x395   :  { %2182 = vmatmul.mubr.msk.f32.gmra.mxu0 %vm132_vm1, %v1463_v9 }
 0x396   :  { %2184 = vmatprep.mubr.msk.f32.mxu0 %vm132_vm1, %v1464_v10 }
 0x399   :  { %2185 = vmatmul.mubr.msk.f32.gmra.mxu0 %vm132_vm1, %v1465_v7 }
 0x449   :  { %v1404_v56 = vpop.f32.mrf.mxu0 }
 0x44a   :  { %v1408_v59 = vrot.slane %v1404_v56, 4 }
 0x44b   :  { %v2172_v11 = vpop.f32.mrf.mxu0 }
 0x44c   :  { %v1409_v12 = vadd.f32 %v1408_v59, %v1404_v56 }
 0x44e   :  { %v1410_v13 = vrot.slane %v1409_v12, 2 }
 0x450   :  { %v1411_v14 = vadd.f32 %v1410_v13, %v1409_v12 }
 0x452   :  { %v1412_v16 = vrot.slane %v1411_v14, 1 }
 0x454   :  { %v1413_v17 = vadd.f32 %v1412_v16, %v1411_v14 }
 0x456   :  { %v1414_v18 = vmul.f32 0.125, %v1413_v17 }
 0x458   :  { %v1415_v21 = vsub.f32 %v1404_v56, %v1414_v18  ;;  %v1426_v35 = vsub.f32 %v2892_v55, %v1414_v18  ;;  %v1427_v36 = vsub.f32 %v2888_v30, %v1414_v18  ;;  %v1428_v41 = vsub.f32 %v2880_v51, %v1414_v18 }
 0x459   :  { %v1429_v47 = vsub.f32 %v2876_v20, %v1414_v18  ;;  %v1430_v1 = vsub.f32 %v2871_v53, %v1414_v18  ;;  %v1431_v19 = vsub.f32 %v2864_v61, %v1414_v18  ;;  %v1432_v30 = vsub.f32 %v2860_v58, %v1414_v18  ;;  %v2177_v20 = vpop.f32.mrf.mxu0  ;;  %v1882_v61 = vld [vmem:[%s3006_s11] ss:$0 sm:$0xff]  ;;  %s2281_s11 = smov [#allocation4]  }
 0x45a   :  { %v1416_v22 = vmul.f32 %v1415_v21, %v1415_v21  ;;  %v1433_v51 = vsub.f32 %v2858_v54, %v1414_v18  ;;  %s1730_s5 = sshll.u32 %s2281_s11, 4  ;;  %s1731_s5 = int_to_ptr.vmem [resolvable:$true] %s1730_s5 }
 0x45b   :  { %v1558_v45 = vpop.f32.mrf.mxu0  ;;  %s2255_s6 = scalar_lea.vmem %s1731_s5, 1024  ;;  %p2260_p1 = scmp.lt.s32.totalorder %s1731_s5, %s1731_s5 }
 0x45c   :  { %v1417_v23 = vrot.slane %v1416_v22, 4  ;;  %p2256_p0 = scmp.ne.s32.totalorder %s1731_s5, %s2255_s6  ;;  %p2261_p2 = scmp.lt.s32.totalorder %s2255_s6, %s2255_s6 }
 0x45d   :  { %v2180_v40 = vpop.f32.mrf.mxu0 }
 0x45e   :  { %v1418_v25 = vadd.f32 %v1417_v23, %v1416_v22  ;;  %p2262_p3 = por %p2261_p2, %p2260_p1 }
 0x45f   :  { %v1568_v53 = vpop.f32.mrf.mxu0 }
 0x460   :  { %v1419_v26 = vrot.slane %v1418_v25, 2  ;;  %p2263_p4 = pnand %p2262_p3, %p2256_p0 }
 0x461   :  { %v2183_v58 = vpop.f32.mrf.mxu0 }
 0x462   :  { %v1420_v27 = vadd.f32 %v1419_v26, %v1418_v25 }
 0x463   :  { %v1578_v57 = vpop.f32.mrf.mxu0 }
 0x464   :  { %v1421_v28 = vrot.slane %v1420_v27, 1 }
 0x465   :  { %v2186_v63 = vpop.f32.mrf.mxu0 }
 0x466   :  { %v1422_v32 = vadd.f32 %v1421_v28, %v1420_v27 }
 0x467   :  { %v1588_v56 = vpop.f32.mrf.mxu0 }
 0x468   :  { %v1423_v33 = vmul.f32 0.14285715, %v1422_v32 }
 0x46a   :  { %v1424_v34 = vadd.f32 1e-05, %v1423_v33 }
 0x46c   :  { %2253 = vrsqrt.f32 %v1424_v34 }
 0x479   :  { %v2254_v37 = vpop.eup %2253 }
 0x47a   :  { %v1434_v38 = vmul.f32 %v2254_v37, %v1426_v35  ;;  %v1435_v39 = vmul.f32 %v2254_v37, %v1427_v36  ;;  %v1436_v44 = vmul.f32 %v2254_v37, %v1428_v41  ;;  %v1437_v5 = vmul.f32 %v2254_v37, %v1429_v47 }
 0x47b   :  { %v1438_v60 = vmul.f32 %v2254_v37, %v1430_v1  ;;  %v1439_v55 = vmul.f32 %v2254_v37, %v1431_v19  ;;  %v1440_v31 = vmul.f32 %v2254_v37, %v1432_v30  ;;  %v1441_v29 = vmul.f32 %v2254_v37, %v1433_v51 }
 0x47c   :  { %2219 = vmatprep.mubr.f32.mxu1 %v1434_v38 }
 0x47d   :  { %2220 = vmatmul.mubr.f32.vlgmr.msra.gmra.mxu1 %v1435_v39 }
 0x47e   :  { %2222 = vmatprep.mubr.f32.mxu1 %v1436_v44 }
 0x481   :  { %2223 = vmatmul.mubr.f32.gmra.mxu1 %v1437_v5 }
 0x482   :  { %2225 = vmatprep.mubr.f32.mxu1 %v1438_v60 }
 0x485   :  { %2226 = vmatmul.mubr.f32.gmra.mxu1 %v1439_v55 }
 0x486   :  { %2228 = vmatprep.mubr.f32.mxu1 %v1440_v31 }
 0x489   :  { %2229 = vmatmul.mubr.f32.gmra.mxu1 %v1441_v29 }
 0x53d   :  { %v2221_v24 = vpop.f32.mrf.mxu1 }
 0x53e   :  { %v1669_v42 = vadd.f32 %v2221_v24, %v2177_v20 }
 0x53f   :  { %v1663_v46 = vpop.f32.mrf.mxu1 }
 0x540   :  { %v1710_v48 = vadd.f32 %v1882_v61, %v1669_v42  ;;  %v1664_v49 = vadd.f32 %v1663_v46, %v1558_v45 }
 0x541   :  { %v2224_v43 = vpop.f32.mrf.mxu1 }
 0x542   :  { %1718 = vst [vmem:[#allocation4 + $0x8] sm:$0xff] %v1710_v48  ;;  %v1709_v54 = vadd.f32 %v1882_v61, %v1664_v49  ;;  %v1679_v52 = vadd.f32 %v2224_v43, %v2180_v40 }
 0x543   :  { %v1673_v50 = vpop.f32.mrf.mxu1 }
 0x544   :  { %1717 = vst [vmem:[#allocation4] sm:$0xff] %v1709_v54  ;;  %v1712_v62 = vadd.f32 %v1882_v61, %v1679_v52  ;;  %v1674_v0 = vadd.f32 %v1673_v50, %v1568_v53 }
 0x545   :  { %v2227_v4 = vpop.f32.mrf.mxu1 }
 0x546   :  { %1720 = vst [vmem:[#allocation4 + $0x18] sm:$0xff] %v1712_v62  ;;  %v1711_v6 = vadd.f32 %v1882_v61, %v1674_v0  ;;  %v1689_v3 = vadd.f32 %v2227_v4, %v2183_v58 }
 0x547   :  { %v1683_v8 = vpop.f32.mrf.mxu1 }
 0x548   :  { %1719 = vst [vmem:[#allocation4 + $0x10] sm:$0xff] %v1711_v6  ;;  %v1714_v2 = vadd.f32 %v1882_v61, %v1689_v3  ;;  %v1684_v15 = vadd.f32 %v1683_v8, %v1578_v57 }
 0x549   :  { %v2230_v9 = vpop.f32.mrf.mxu1 }
 0x54a   :  { %1722 = vst [vmem:[#allocation4 + $0x28] sm:$0xff] %v1714_v2  ;;  %v1713_v10 = vadd.f32 %v1882_v61, %v1684_v15  ;;  %v1699_v7 = vadd.f32 %v2230_v9, %v2186_v63 }
 0x54b   :  { %v1693_v59 = vpop.f32.mrf.mxu1 }
 0x54c   :  { %1721 = vst [vmem:[#allocation4 + $0x20] sm:$0xff] %v1713_v10  ;;  %v1716_v11 = vadd.f32 %v1882_v61, %v1699_v7  ;;  %v1694_v12 = vadd.f32 %v1693_v59, %v1588_v56 }
 0x54e   :  { %1724 = vst [vmem:[#allocation4 + $0x38] sm:$0xff] %v1716_v11  ;;  %v1715_v13 = vadd.f32 %v1882_v61, %v1694_v12 }
 0x550   :  { %1723 = vst [vmem:[#allocation4 + $0x30] sm:$0xff] %v1715_v13 }
 0x551   :  { %2266 = shalt.err (!%p2263_p4)
}
 0x552   :  { %s2282_s22 = smov 128   ;;  %s2283_s2 = smov 8  }
 0x553   :  { %1736 = dma.vmem_to_hbm [thread:$0]  %s1731_s5, 1024, %s3007_s12, [#allocation5], %s2282_s22, %s2282_s22, %s2283_s2  }
 0x554   :  { %2275 = dma.done.wait [#allocation5], 1024  }
 0x555   :  { %2276 = vsyncadd [#allocation5], 4294966272 }
 0x556   :  { %1740 = vsyncpa [#allocation5], 1 }

</bundles_post_ra>
